<compile_context>
chip_gen: v7x
topology: tpu7x:2x2x1
jax: 0.10.0
libtpu: 0.0.40
codegen_flags: <defaults>
</compile_context>

<pallas_src>
import functools

import jax
import jax.numpy as jnp
from jax.experimental import pallas as pl
from jax.experimental.pallas import tpu as pltpu


def _round_up(x, m):
    return ((x + m - 1) // m) * m


def _lstm_disc_kernel(sig_ref, whh_ref, wfc_ref, bfc_ref, out_ref, *,
                      seq_len, hidden_pad, idx_x, idx_one):
    """LSTM recurrence + final linear + sigmoid for one batch tile.

    sig_ref : (BT, T)    raw signal tile (batch on sublanes, time on lanes)
    whh_ref : (Hp, 4Hp)  augmented recurrent weights: rows 0..H-1 = W_hh,
                         row idx_x = W_ih, row idx_one = b_ih + b_hh,
                         gate order [i, f, o, g], gate columns padded H -> Hp
    wfc_ref : (1, Hp)    final linear weights (padded lanes are 0)
    bfc_ref : (1, 1)     final linear bias (SMEM scalar)
    out_ref : (BT, 128)  sigmoid(logit) broadcast across lanes (lane-dense store)
    """
    Hp = hidden_pad
    BT = sig_ref.shape[0]

    whh = whh_ref[...]                      # loop-invariant MXU RHS, loaded once
    wfc = wfc_ref[...]                      # (1, Hp)
    sig = sig_ref[...]                      # (BT, T)

    lane = jax.lax.broadcasted_iota(jnp.int32, (BT, Hp), 1)
    x_sel = (lane == idx_x).astype(jnp.float32)      # one-hot lane for x_t
    one_sel = (lane == idx_one).astype(jnp.float32)  # one-hot lane of 1.0 (bias row)
    t_iota = jax.lax.broadcasted_iota(jnp.int32, sig.shape, 1)

    def x_col(t):
        # Column t of the signal tile via a masked lane reduction (no sub-lane
        # ref slicing; independent of h/c so it sits off the critical path).
        return jnp.sum(sig * (t_iota == t).astype(jnp.float32),
                       axis=1, keepdims=True)                      # (BT, 1)

    def step(t, h, c):
        # Inject x_t and the constant 1.0 into the guaranteed-zero padded lanes
        # of h; the augmented W_hh rows carry W_ih and the bias, so a single
        # matmul per step yields all gate pre-activations (no per-step bias or
        # broadcast adds in the serial chain).
        inj = x_col(t) * x_sel + one_sel
        gates = jnp.dot(h + inj, whh,
                        preferred_element_type=jnp.float32)        # (BT, 4Hp)
        sg = jax.nn.sigmoid(gates[:, :3 * Hp])      # [i | f | o], one EUP pass
        g_g = jnp.tanh(gates[:, 3 * Hp:])
        i_g = sg[:, :Hp]
        f_g = sg[:, Hp:2 * Hp]
        o_g = sg[:, 2 * Hp:3 * Hp]
        c = f_g * c + i_g * g_g
        h = o_g * jnp.tanh(c)
        return h, c

    h = jnp.zeros((BT, Hp), jnp.float32)
    c = jnp.zeros((BT, Hp), jnp.float32)

    if BT <= 8:
        # Small tile: fully unroll (static trip count, full scheduler
        # visibility, live set is tiny so no spill risk).
        for t in range(seq_len):
            h, c = step(t, h, c)
    else:
        # Tall tile: bound live ranges so the unrolled chain cannot spill vregs.
        def body(t, carry):
            return step(t, *carry)
        h, c = jax.lax.fori_loop(0, seq_len, body, (h, c))

    # Final Linear(H, 1) + sigmoid as a lane reduction (no N=1 MXU push);
    # lane-dense (BT, 128) store.  Padded h lanes and padded wfc lanes are 0.
    logit = jnp.sum(h * wfc, axis=-1, keepdims=True) + bfc_ref[0, 0]
    out_ref[...] = jnp.broadcast_to(jax.nn.sigmoid(logit), out_ref.shape)


@functools.partial(jax.jit, static_argnames=("hidden_pad", "idx_x", "idx_one"))
def _forward_impl(signal, w_hh_aug, w_fc, b_fc, *, hidden_pad, idx_x, idx_one):
    B, T, _ = signal.shape
    Hp = hidden_pad

    # Generation-aware batch tile: up to 128 rows per tile (full v5e MXU LHS
    # height; fine on v6e/v7x).  Single-block path (no grid) when batch fits.
    MAX_BT = 128
    B_pad = _round_up(B, 8)
    if B_pad <= MAX_BT:
        BT, num_tiles = B_pad, 1
    else:
        BT = MAX_BT
        num_tiles = _round_up(B_pad, BT) // BT      # v7x note: even tile counts
        B_pad = num_tiles * BT                      # balance the 2 TensorCores

    sig = jnp.pad(signal[:, :, 0], ((0, B_pad - B), (0, 0)))        # (B_pad, T)

    kernel = functools.partial(_lstm_disc_kernel, seq_len=T, hidden_pad=Hp,
                               idx_x=idx_x, idx_one=idx_one)
    out_shape = jax.ShapeDtypeStruct((B_pad, 128), jnp.float32)

    if num_tiles == 1:
        # Whole problem resident in VMEM: skip the grid / pipeline machinery.
        out = pl.pallas_call(
            kernel,
            out_shape=out_shape,
            in_specs=[
                pl.BlockSpec(memory_space=pltpu.MemorySpace.VMEM),   # signal
                pl.BlockSpec(memory_space=pltpu.MemorySpace.VMEM),   # W_hh (aug)
                pl.BlockSpec(memory_space=pltpu.MemorySpace.VMEM),   # W_fc
                pl.BlockSpec(memory_space=pltpu.MemorySpace.SMEM),   # b_fc scalar
            ],
            out_specs=pl.BlockSpec(memory_space=pltpu.MemorySpace.VMEM),
        )(sig, w_hh_aug, w_fc, b_fc)
    else:
        out = pl.pallas_call(
            kernel,
            out_shape=out_shape,
            grid=(num_tiles,),
            in_specs=[
                pl.BlockSpec((BT, T), lambda b: (b, 0)),             # signal tile
                pl.BlockSpec((Hp, 4 * Hp), lambda b: (0, 0)),        # resident W_hh
                pl.BlockSpec((1, Hp), lambda b: (0, 0)),             # resident W_fc
                pl.BlockSpec(memory_space=pltpu.MemorySpace.SMEM),   # b_fc scalar
            ],
            out_specs=pl.BlockSpec((BT, 128), lambda b: (b, 0)),
            compiler_params=pltpu.CompilerParams(
                dimension_semantics=("parallel",)),                  # v7x: 2 TCs
        )(sig, w_hh_aug, w_fc, b_fc)

    return out[:B, :1]


def eeg_discriminator_forward(signal, packed):
    """signal: (B, T, 1) float32.  Returns (B, 1) float32 probabilities."""
    return _forward_impl(signal, packed["w_hh_aug"], packed["w_fc"],
                         packed["b_fc"], hidden_pad=packed["hidden_pad"],
                         idx_x=packed["idx_x"], idx_one=packed["idx_one"])


def init_params(key, hidden_dim):
    """PyTorch-style uniform(-1/sqrt(H), 1/sqrt(H)) init, gate order [i,f,g,o]."""
    H = hidden_dim
    k = 1.0 / (H ** 0.5)
    ks = jax.random.split(key, 6)
    w_ih = jax.random.uniform(ks[0], (1, 4 * H), jnp.float32, -k, k)
    w_hh = jax.random.uniform(ks[1], (H, 4 * H), jnp.float32, -k, k)
    b_ih = jax.random.uniform(ks[2], (1, 4 * H), jnp.float32, -k, k)
    b_hh = jax.random.uniform(ks[3], (1, 4 * H), jnp.float32, -k, k)
    w_fc = jax.random.uniform(ks[4], (H, 1), jnp.float32, -k, k)
    b_fc = jax.random.uniform(ks[5], (1, 1), jnp.float32, -k, k)
    return dict(w_ih=w_ih, w_hh=w_hh, b=b_ih + b_hh, w_fc=w_fc, b_fc=b_fc)


def pack_params(params, hidden_dim):
    """Reorder gates [i,f,g,o] -> [i,f,o,g], pad gate columns H -> Hp, and fold
    W_ih / bias into spare rows of an augmented W_hh.

    Padded gate columns have zero weights in every row, so their
    pre-activations are 0 every step and the padded h/c lanes stay exactly 0 —
    which is what allows the x_t / 1.0 injection into lanes idx_x / idx_one.
    """
    H = hidden_dim
    Hp = _round_up(H + 2, 128)              # room for the x lane + constant-1 lane
    assert Hp >= H + 2
    pad_c = Hp - H

    def reorder_pad_cols(a):                # (..., 4H) -> (..., 4Hp), order [i,f,o,g]
        gi, gf, gg, go = (a[..., j * H:(j + 1) * H] for j in range(4))
        widths = [(0, 0)] * (a.ndim - 1) + [(0, pad_c)]
        return jnp.concatenate([jnp.pad(p, widths) for p in (gi, gf, go, gg)],
                               axis=-1)

    w_hh_rows = reorder_pad_cols(params["w_hh"])                    # (H, 4Hp)
    w_ih_row = reorder_pad_cols(params["w_ih"])                     # (1, 4Hp)
    b_row = reorder_pad_cols(params["b"])                           # (1, 4Hp)
    tail = jnp.zeros((Hp - H - 2, 4 * Hp), jnp.float32)
    w_hh_aug = jnp.concatenate([w_hh_rows, w_ih_row, b_row, tail], axis=0)

    w_fc = jnp.pad(params["w_fc"][:, 0], (0, pad_c))[None, :]       # (1, Hp)
    return dict(w_hh_aug=w_hh_aug, w_fc=w_fc, b_fc=params["b_fc"],
                hidden_pad=Hp, idx_x=H, idx_one=H + 1)


def reference_forward(signal, params):
    """Pure-JAX reference with identical semantics (unpadded, gate order i,f,g,o)."""
    B, T, _ = signal.shape
    H = params["w_hh"].shape[0]
    h = jnp.zeros((B, H), jnp.float32)
    c = jnp.zeros((B, H), jnp.float32)
    for t in range(T):
        x_t = signal[:, t, :]                                       # (B, 1)
        gates = x_t * params["w_ih"] + h @ params["w_hh"] + params["b"]
        i = jax.nn.sigmoid(gates[:, :H])
        f = jax.nn.sigmoid(gates[:, H:2 * H])
        g = jnp.tanh(gates[:, 2 * H:3 * H])
        o = jax.nn.sigmoid(gates[:, 3 * H:])
        c = f * c + i * g
        h = o * jnp.tanh(c)
    return jax.nn.sigmoid(h @ params["w_fc"] + params["b_fc"])


if __name__ == "__main__":
    B, T, H = 2, 16, 64          # batch, signal_length, hidden_dim
    key = jax.random.PRNGKey(0)
    k_sig, k_par = jax.random.split(key)

    signal = jax.random.normal(k_sig, (B, T, 1), jnp.float32)
    params = init_params(k_par, H)
    packed = pack_params(params, H)

    # Layout-safety asserts (review): padded gate columns / fc lanes must stay 0
    # so future layout changes can't silently break the zero-padded-lane invariant.
    Hp = packed["hidden_pad"]
    for g in range(4):
        assert bool(jnp.all(packed["w_hh_aug"][:, g * Hp + H:(g + 1) * Hp] == 0.0))
    assert bool(jnp.all(packed["w_fc"][0, H:] == 0.0))

    out = jax.block_until_ready(eeg_discriminator_forward(signal, packed))
    ref = reference_forward(signal, params)

    assert out.shape == (B, 1)
    assert bool(jnp.all(jnp.isfinite(out)))
    assert bool(jnp.allclose(out, ref, atol=1e-5, rtol=1e-5)), (out, ref)

    print("KERNEL_OK")
</pallas_src>

<mosaic_0001>
module attributes {stable_mosaic.version = 11 : i64} {
  func.func @_lstm_disc_kernel(%arg0: memref<8x16xf32, #tpu.memory_space<vmem>>, %arg1: memref<128x512xf32, #tpu.memory_space<vmem>>, %arg2: memref<1x128xf32, #tpu.memory_space<vmem>>, %arg3: memref<1x1xf32, #tpu.memory_space<smem>>, %arg4: memref<8x128xf32, #tpu.memory_space<vmem>>) attributes {dimension_semantics = [], scalar_prefetch = 0 : i64, scratch_operands = 0 : i64, tpu.core_type = #tpu.core_type<tc>} {
    %c0 = arith.constant 0 : index
    %c0_0 = arith.constant 0 : index
    %0 = vector.load %arg1[%c0, %c0_0] : memref<128x512xf32, #tpu.memory_space<vmem>>, vector<128x512xf32>
    %c0_1 = arith.constant 0 : index
    %c0_2 = arith.constant 0 : index
    %1 = vector.load %arg2[%c0_1, %c0_2] : memref<1x128xf32, #tpu.memory_space<vmem>>, vector<1x128xf32>
    %c0_3 = arith.constant 0 : index
    %c0_4 = arith.constant 0 : index
    %2 = vector.load %arg0[%c0_3, %c0_4] : memref<8x16xf32, #tpu.memory_space<vmem>>, vector<8x16xf32>
    %3 = tpu.iota {dimensions = array<i32: 1>} : vector<8x128xi32>
    %c64_i32 = arith.constant 64 : i32
    %4 = vector.broadcast %c64_i32 : i32 to vector<8x128xi32>
    %5 = arith.cmpi eq, %3, %4 : vector<8x128xi32>
    %6 = arith.extui %5 : vector<8x128xi1> to vector<8x128xi32>
    %7 = arith.sitofp %6 : vector<8x128xi32> to vector<8x128xf32>
    %c65_i32 = arith.constant 65 : i32
    %8 = vector.broadcast %c65_i32 : i32 to vector<8x128xi32>
    %9 = arith.cmpi eq, %3, %8 : vector<8x128xi32>
    %10 = arith.extui %9 : vector<8x128xi1> to vector<8x128xi32>
    %11 = arith.sitofp %10 : vector<8x128xi32> to vector<8x128xf32>
    %12 = tpu.iota {dimensions = array<i32: 1>} : vector<8x16xi32>
    %cst = arith.constant 0.000000e+00 : f32
    %13 = vector.broadcast %cst : f32 to vector<8x128xf32>
    %cst_5 = arith.constant 0.000000e+00 : f32
    %14 = vector.broadcast %cst_5 : f32 to vector<8x128xf32>
    %c0_i32 = arith.constant 0 : i32
    %15 = vector.broadcast %c0_i32 : i32 to vector<8x16xi32>
    %16 = arith.cmpi eq, %12, %15 : vector<8x16xi32>
    %17 = arith.extui %16 : vector<8x16xi1> to vector<8x16xi32>
    %18 = arith.sitofp %17 : vector<8x16xi32> to vector<8x16xf32>
    %19 = arith.mulf %2, %18 : vector<8x16xf32>
    %cst_6 = arith.constant dense<0.000000e+00> : vector<8xf32>
    %20 = vector.multi_reduction <add>, %19, %cst_6 [1] : vector<8x16xf32> to vector<8xf32>
    %21 = vector.shape_cast %20 : vector<8xf32> to vector<8x1xf32>
    %22 = vector.broadcast %21 : vector<8x1xf32> to vector<8x128xf32>
    %23 = arith.mulf %22, %7 : vector<8x128xf32>
    %24 = arith.addf %23, %11 : vector<8x128xf32>
    %25 = arith.addf %13, %24 : vector<8x128xf32>
    %cst_7 = arith.constant dense<0.000000e+00> : vector<8x512xf32>
    %26 = tpu.matmul %25, %0, %cst_7 {dimension_numbers = #tpu.dot_dimension_numbers<[1], [0], [0], [1], [0, 0, 1, 1], [], []>} : vector<8x128xf32>, vector<128x512xf32>, vector<8x512xf32> -> vector<8x512xf32>
    %27 = vector.extract_strided_slice %26 {offsets = [0, 0], sizes = [8, 384], strides = [1, 1]} : vector<8x512xf32> to vector<8x384xf32>
    %28 = arith.negf %27 : vector<8x384xf32>
    %29 = math.exp %28 : vector<8x384xf32>
    %cst_8 = arith.constant 1.000000e+00 : f32
    %30 = vector.broadcast %cst_8 : f32 to vector<8x384xf32>
    %31 = arith.addf %30, %29 : vector<8x384xf32>
    %32 = arith.divf %30, %31 : vector<8x384xf32>
    %33 = vector.extract_strided_slice %26 {offsets = [0, 384], sizes = [8, 128], strides = [1, 1]} : vector<8x512xf32> to vector<8x128xf32>
    %34 = math.tanh %33 : vector<8x128xf32>
    %35 = vector.extract_strided_slice %32 {offsets = [0, 0], sizes = [8, 128], strides = [1, 1]} : vector<8x384xf32> to vector<8x128xf32>
    %36 = vector.extract_strided_slice %32 {offsets = [0, 128], sizes = [8, 128], strides = [1, 1]} : vector<8x384xf32> to vector<8x128xf32>
    %37 = vector.extract_strided_slice %32 {offsets = [0, 256], sizes = [8, 128], strides = [1, 1]} : vector<8x384xf32> to vector<8x128xf32>
    %38 = arith.mulf %36, %14 : vector<8x128xf32>
    %39 = arith.mulf %35, %34 : vector<8x128xf32>
    %40 = arith.addf %38, %39 : vector<8x128xf32>
    %41 = math.tanh %40 : vector<8x128xf32>
    %42 = arith.mulf %37, %41 : vector<8x128xf32>
    %c1_i32 = arith.constant 1 : i32
    %43 = vector.broadcast %c1_i32 : i32 to vector<8x16xi32>
    %44 = arith.cmpi eq, %12, %43 : vector<8x16xi32>
    %45 = arith.extui %44 : vector<8x16xi1> to vector<8x16xi32>
    %46 = arith.sitofp %45 : vector<8x16xi32> to vector<8x16xf32>
    %47 = arith.mulf %2, %46 : vector<8x16xf32>
    %cst_9 = arith.constant dense<0.000000e+00> : vector<8xf32>
    %48 = vector.multi_reduction <add>, %47, %cst_9 [1] : vector<8x16xf32> to vector<8xf32>
    %49 = vector.shape_cast %48 : vector<8xf32> to vector<8x1xf32>
    %50 = vector.broadcast %49 : vector<8x1xf32> to vector<8x128xf32>
    %51 = arith.mulf %50, %7 : vector<8x128xf32>
    %52 = arith.addf %51, %11 : vector<8x128xf32>
    %53 = arith.addf %42, %52 : vector<8x128xf32>
    %cst_10 = arith.constant dense<0.000000e+00> : vector<8x512xf32>
    %54 = tpu.matmul %53, %0, %cst_10 {dimension_numbers = #tpu.dot_dimension_numbers<[1], [0], [0], [1], [0, 0, 1, 1], [], []>} : vector<8x128xf32>, vector<128x512xf32>, vector<8x512xf32> -> vector<8x512xf32>
    %55 = vector.extract_strided_slice %54 {offsets = [0, 0], sizes = [8, 384], strides = [1, 1]} : vector<8x512xf32> to vector<8x384xf32>
    %56 = arith.negf %55 : vector<8x384xf32>
    %57 = math.exp %56 : vector<8x384xf32>
    %cst_11 = arith.constant 1.000000e+00 : f32
    %58 = vector.broadcast %cst_11 : f32 to vector<8x384xf32>
    %59 = arith.addf %58, %57 : vector<8x384xf32>
    %60 = arith.divf %58, %59 : vector<8x384xf32>
    %61 = vector.extract_strided_slice %54 {offsets = [0, 384], sizes = [8, 128], strides = [1, 1]} : vector<8x512xf32> to vector<8x128xf32>
    %62 = math.tanh %61 : vector<8x128xf32>
    %63 = vector.extract_strided_slice %60 {offsets = [0, 0], sizes = [8, 128], strides = [1, 1]} : vector<8x384xf32> to vector<8x128xf32>
    %64 = vector.extract_strided_slice %60 {offsets = [0, 128], sizes = [8, 128], strides = [1, 1]} : vector<8x384xf32> to vector<8x128xf32>
    %65 = vector.extract_strided_slice %60 {offsets = [0, 256], sizes = [8, 128], strides = [1, 1]} : vector<8x384xf32> to vector<8x128xf32>
    %66 = arith.mulf %64, %40 : vector<8x128xf32>
    %67 = arith.mulf %63, %62 : vector<8x128xf32>
    %68 = arith.addf %66, %67 : vector<8x128xf32>
    %69 = math.tanh %68 : vector<8x128xf32>
    %70 = arith.mulf %65, %69 : vector<8x128xf32>
    %c2_i32 = arith.constant 2 : i32
    %71 = vector.broadcast %c2_i32 : i32 to vector<8x16xi32>
    %72 = arith.cmpi eq, %12, %71 : vector<8x16xi32>
    %73 = arith.extui %72 : vector<8x16xi1> to vector<8x16xi32>
    %74 = arith.sitofp %73 : vector<8x16xi32> to vector<8x16xf32>
    %75 = arith.mulf %2, %74 : vector<8x16xf32>
    %cst_12 = arith.constant dense<0.000000e+00> : vector<8xf32>
    %76 = vector.multi_reduction <add>, %75, %cst_12 [1] : vector<8x16xf32> to vector<8xf32>
    %77 = vector.shape_cast %76 : vector<8xf32> to vector<8x1xf32>
    %78 = vector.broadcast %77 : vector<8x1xf32> to vector<8x128xf32>
    %79 = arith.mulf %78, %7 : vector<8x128xf32>
    %80 = arith.addf %79, %11 : vector<8x128xf32>
    %81 = arith.addf %70, %80 : vector<8x128xf32>
    %cst_13 = arith.constant dense<0.000000e+00> : vector<8x512xf32>
    %82 = tpu.matmul %81, %0, %cst_13 {dimension_numbers = #tpu.dot_dimension_numbers<[1], [0], [0], [1], [0, 0, 1, 1], [], []>} : vector<8x128xf32>, vector<128x512xf32>, vector<8x512xf32> -> vector<8x512xf32>
    %83 = vector.extract_strided_slice %82 {offsets = [0, 0], sizes = [8, 384], strides = [1, 1]} : vector<8x512xf32> to vector<8x384xf32>
    %84 = arith.negf %83 : vector<8x384xf32>
    %85 = math.exp %84 : vector<8x384xf32>
    %cst_14 = arith.constant 1.000000e+00 : f32
    %86 = vector.broadcast %cst_14 : f32 to vector<8x384xf32>
    %87 = arith.addf %86, %85 : vector<8x384xf32>
    %88 = arith.divf %86, %87 : vector<8x384xf32>
    %89 = vector.extract_strided_slice %82 {offsets = [0, 384], sizes = [8, 128], strides = [1, 1]} : vector<8x512xf32> to vector<8x128xf32>
    %90 = math.tanh %89 : vector<8x128xf32>
    %91 = vector.extract_strided_slice %88 {offsets = [0, 0], sizes = [8, 128], strides = [1, 1]} : vector<8x384xf32> to vector<8x128xf32>
    %92 = vector.extract_strided_slice %88 {offsets = [0, 128], sizes = [8, 128], strides = [1, 1]} : vector<8x384xf32> to vector<8x128xf32>
    %93 = vector.extract_strided_slice %88 {offsets = [0, 256], sizes = [8, 128], strides = [1, 1]} : vector<8x384xf32> to vector<8x128xf32>
    %94 = arith.mulf %92, %68 : vector<8x128xf32>
    %95 = arith.mulf %91, %90 : vector<8x128xf32>
    %96 = arith.addf %94, %95 : vector<8x128xf32>
    %97 = math.tanh %96 : vector<8x128xf32>
    %98 = arith.mulf %93, %97 : vector<8x128xf32>
    %c3_i32 = arith.constant 3 : i32
    %99 = vector.broadcast %c3_i32 : i32 to vector<8x16xi32>
    %100 = arith.cmpi eq, %12, %99 : vector<8x16xi32>
    %101 = arith.extui %100 : vector<8x16xi1> to vector<8x16xi32>
    %102 = arith.sitofp %101 : vector<8x16xi32> to vector<8x16xf32>
    %103 = arith.mulf %2, %102 : vector<8x16xf32>
    %cst_15 = arith.constant dense<0.000000e+00> : vector<8xf32>
    %104 = vector.multi_reduction <add>, %103, %cst_15 [1] : vector<8x16xf32> to vector<8xf32>
    %105 = vector.shape_cast %104 : vector<8xf32> to vector<8x1xf32>
    %106 = vector.broadcast %105 : vector<8x1xf32> to vector<8x128xf32>
    %107 = arith.mulf %106, %7 : vector<8x128xf32>
    %108 = arith.addf %107, %11 : vector<8x128xf32>
    %109 = arith.addf %98, %108 : vector<8x128xf32>
    %cst_16 = arith.constant dense<0.000000e+00> : vector<8x512xf32>
    %110 = tpu.matmul %109, %0, %cst_16 {dimension_numbers = #tpu.dot_dimension_numbers<[1], [0], [0], [1], [0, 0, 1, 1], [], []>} : vector<8x128xf32>, vector<128x512xf32>, vector<8x512xf32> -> vector<8x512xf32>
    %111 = vector.extract_strided_slice %110 {offsets = [0, 0], sizes = [8, 384], strides = [1, 1]} : vector<8x512xf32> to vector<8x384xf32>
    %112 = arith.negf %111 : vector<8x384xf32>
    %113 = math.exp %112 : vector<8x384xf32>
    %cst_17 = arith.constant 1.000000e+00 : f32
    %114 = vector.broadcast %cst_17 : f32 to vector<8x384xf32>
    %115 = arith.addf %114, %113 : vector<8x384xf32>
    %116 = arith.divf %114, %115 : vector<8x384xf32>
    %117 = vector.extract_strided_slice %110 {offsets = [0, 384], sizes = [8, 128], strides = [1, 1]} : vector<8x512xf32> to vector<8x128xf32>
    %118 = math.tanh %117 : vector<8x128xf32>
    %119 = vector.extract_strided_slice %116 {offsets = [0, 0], sizes = [8, 128], strides = [1, 1]} : vector<8x384xf32> to vector<8x128xf32>
    %120 = vector.extract_strided_slice %116 {offsets = [0, 128], sizes = [8, 128], strides = [1, 1]} : vector<8x384xf32> to vector<8x128xf32>
    %121 = vector.extract_strided_slice %116 {offsets = [0, 256], sizes = [8, 128], strides = [1, 1]} : vector<8x384xf32> to vector<8x128xf32>
    %122 = arith.mulf %120, %96 : vector<8x128xf32>
    %123 = arith.mulf %119, %118 : vector<8x128xf32>
    %124 = arith.addf %122, %123 : vector<8x128xf32>
    %125 = math.tanh %124 : vector<8x128xf32>
    %126 = arith.mulf %121, %125 : vector<8x128xf32>
    %c4_i32 = arith.constant 4 : i32
    %127 = vector.broadcast %c4_i32 : i32 to vector<8x16xi32>
    %128 = arith.cmpi eq, %12, %127 : vector<8x16xi32>
    %129 = arith.extui %128 : vector<8x16xi1> to vector<8x16xi32>
    %130 = arith.sitofp %129 : vector<8x16xi32> to vector<8x16xf32>
    %131 = arith.mulf %2, %130 : vector<8x16xf32>
    %cst_18 = arith.constant dense<0.000000e+00> : vector<8xf32>
    %132 = vector.multi_reduction <add>, %131, %cst_18 [1] : vector<8x16xf32> to vector<8xf32>
    %133 = vector.shape_cast %132 : vector<8xf32> to vector<8x1xf32>
    %134 = vector.broadcast %133 : vector<8x1xf32> to vector<8x128xf32>
    %135 = arith.mulf %134, %7 : vector<8x128xf32>
    %136 = arith.addf %135, %11 : vector<8x128xf32>
    %137 = arith.addf %126, %136 : vector<8x128xf32>
    %cst_19 = arith.constant dense<0.000000e+00> : vector<8x512xf32>
    %138 = tpu.matmul %137, %0, %cst_19 {dimension_numbers = #tpu.dot_dimension_numbers<[1], [0], [0], [1], [0, 0, 1, 1], [], []>} : vector<8x128xf32>, vector<128x512xf32>, vector<8x512xf32> -> vector<8x512xf32>
    %139 = vector.extract_strided_slice %138 {offsets = [0, 0], sizes = [8, 384], strides = [1, 1]} : vector<8x512xf32> to vector<8x384xf32>
    %140 = arith.negf %139 : vector<8x384xf32>
    %141 = math.exp %140 : vector<8x384xf32>
    %cst_20 = arith.constant 1.000000e+00 : f32
    %142 = vector.broadcast %cst_20 : f32 to vector<8x384xf32>
    %143 = arith.addf %142, %141 : vector<8x384xf32>
    %144 = arith.divf %142, %143 : vector<8x384xf32>
    %145 = vector.extract_strided_slice %138 {offsets = [0, 384], sizes = [8, 128], strides = [1, 1]} : vector<8x512xf32> to vector<8x128xf32>
    %146 = math.tanh %145 : vector<8x128xf32>
    %147 = vector.extract_strided_slice %144 {offsets = [0, 0], sizes = [8, 128], strides = [1, 1]} : vector<8x384xf32> to vector<8x128xf32>
    %148 = vector.extract_strided_slice %144 {offsets = [0, 128], sizes = [8, 128], strides = [1, 1]} : vector<8x384xf32> to vector<8x128xf32>
    %149 = vector.extract_strided_slice %144 {offsets = [0, 256], sizes = [8, 128], strides = [1, 1]} : vector<8x384xf32> to vector<8x128xf32>
    %150 = arith.mulf %148, %124 : vector<8x128xf32>
    %151 = arith.mulf %147, %146 : vector<8x128xf32>
    %152 = arith.addf %150, %151 : vector<8x128xf32>
    %153 = math.tanh %152 : vector<8x128xf32>
    %154 = arith.mulf %149, %153 : vector<8x128xf32>
    %c5_i32 = arith.constant 5 : i32
    %155 = vector.broadcast %c5_i32 : i32 to vector<8x16xi32>
    %156 = arith.cmpi eq, %12, %155 : vector<8x16xi32>
    %157 = arith.extui %156 : vector<8x16xi1> to vector<8x16xi32>
    %158 = arith.sitofp %157 : vector<8x16xi32> to vector<8x16xf32>
    %159 = arith.mulf %2, %158 : vector<8x16xf32>
    %cst_21 = arith.constant dense<0.000000e+00> : vector<8xf32>
    %160 = vector.multi_reduction <add>, %159, %cst_21 [1] : vector<8x16xf32> to vector<8xf32>
    %161 = vector.shape_cast %160 : vector<8xf32> to vector<8x1xf32>
    %162 = vector.broadcast %161 : vector<8x1xf32> to vector<8x128xf32>
    %163 = arith.mulf %162, %7 : vector<8x128xf32>
    %164 = arith.addf %163, %11 : vector<8x128xf32>
    %165 = arith.addf %154, %164 : vector<8x128xf32>
    %cst_22 = arith.constant dense<0.000000e+00> : vector<8x512xf32>
    %166 = tpu.matmul %165, %0, %cst_22 {dimension_numbers = #tpu.dot_dimension_numbers<[1], [0], [0], [1], [0, 0, 1, 1], [], []>} : vector<8x128xf32>, vector<128x512xf32>, vector<8x512xf32> -> vector<8x512xf32>
    %167 = vector.extract_strided_slice %166 {offsets = [0, 0], sizes = [8, 384], strides = [1, 1]} : vector<8x512xf32> to vector<8x384xf32>
    %168 = arith.negf %167 : vector<8x384xf32>
    %169 = math.exp %168 : vector<8x384xf32>
    %cst_23 = arith.constant 1.000000e+00 : f32
    %170 = vector.broadcast %cst_23 : f32 to vector<8x384xf32>
    %171 = arith.addf %170, %169 : vector<8x384xf32>
    %172 = arith.divf %170, %171 : vector<8x384xf32>
    %173 = vector.extract_strided_slice %166 {offsets = [0, 384], sizes = [8, 128], strides = [1, 1]} : vector<8x512xf32> to vector<8x128xf32>
    %174 = math.tanh %173 : vector<8x128xf32>
    %175 = vector.extract_strided_slice %172 {offsets = [0, 0], sizes = [8, 128], strides = [1, 1]} : vector<8x384xf32> to vector<8x128xf32>
    %176 = vector.extract_strided_slice %172 {offsets = [0, 128], sizes = [8, 128], strides = [1, 1]} : vector<8x384xf32> to vector<8x128xf32>
    %177 = vector.extract_strided_slice %172 {offsets = [0, 256], sizes = [8, 128], strides = [1, 1]} : vector<8x384xf32> to vector<8x128xf32>
    %178 = arith.mulf %176, %152 : vector<8x128xf32>
    %179 = arith.mulf %175, %174 : vector<8x128xf32>
    %180 = arith.addf %178, %179 : vector<8x128xf32>
    %181 = math.tanh %180 : vector<8x128xf32>
    %182 = arith.mulf %177, %181 : vector<8x128xf32>
    %c6_i32 = arith.constant 6 : i32
    %183 = vector.broadcast %c6_i32 : i32 to vector<8x16xi32>
    %184 = arith.cmpi eq, %12, %183 : vector<8x16xi32>
    %185 = arith.extui %184 : vector<8x16xi1> to vector<8x16xi32>
    %186 = arith.sitofp %185 : vector<8x16xi32> to vector<8x16xf32>
    %187 = arith.mulf %2, %186 : vector<8x16xf32>
    %cst_24 = arith.constant dense<0.000000e+00> : vector<8xf32>
    %188 = vector.multi_reduction <add>, %187, %cst_24 [1] : vector<8x16xf32> to vector<8xf32>
    %189 = vector.shape_cast %188 : vector<8xf32> to vector<8x1xf32>
    %190 = vector.broadcast %189 : vector<8x1xf32> to vector<8x128xf32>
    %191 = arith.mulf %190, %7 : vector<8x128xf32>
    %192 = arith.addf %191, %11 : vector<8x128xf32>
    %193 = arith.addf %182, %192 : vector<8x128xf32>
    %cst_25 = arith.constant dense<0.000000e+00> : vector<8x512xf32>
    %194 = tpu.matmul %193, %0, %cst_25 {dimension_numbers = #tpu.dot_dimension_numbers<[1], [0], [0], [1], [0, 0, 1, 1], [], []>} : vector<8x128xf32>, vector<128x512xf32>, vector<8x512xf32> -> vector<8x512xf32>
    %195 = vector.extract_strided_slice %194 {offsets = [0, 0], sizes = [8, 384], strides = [1, 1]} : vector<8x512xf32> to vector<8x384xf32>
    %196 = arith.negf %195 : vector<8x384xf32>
    %197 = math.exp %196 : vector<8x384xf32>
    %cst_26 = arith.constant 1.000000e+00 : f32
    %198 = vector.broadcast %cst_26 : f32 to vector<8x384xf32>
    %199 = arith.addf %198, %197 : vector<8x384xf32>
    %200 = arith.divf %198, %199 : vector<8x384xf32>
    %201 = vector.extract_strided_slice %194 {offsets = [0, 384], sizes = [8, 128], strides = [1, 1]} : vector<8x512xf32> to vector<8x128xf32>
    %202 = math.tanh %201 : vector<8x128xf32>
    %203 = vector.extract_strided_slice %200 {offsets = [0, 0], sizes = [8, 128], strides = [1, 1]} : vector<8x384xf32> to vector<8x128xf32>
    %204 = vector.extract_strided_slice %200 {offsets = [0, 128], sizes = [8, 128], strides = [1, 1]} : vector<8x384xf32> to vector<8x128xf32>
    %205 = vector.extract_strided_slice %200 {offsets = [0, 256], sizes = [8, 128], strides = [1, 1]} : vector<8x384xf32> to vector<8x128xf32>
    %206 = arith.mulf %204, %180 : vector<8x128xf32>
    %207 = arith.mulf %203, %202 : vector<8x128xf32>
    %208 = arith.addf %206, %207 : vector<8x128xf32>
    %209 = math.tanh %208 : vector<8x128xf32>
    %210 = arith.mulf %205, %209 : vector<8x128xf32>
    %c7_i32 = arith.constant 7 : i32
    %211 = vector.broadcast %c7_i32 : i32 to vector<8x16xi32>
    %212 = arith.cmpi eq, %12, %211 : vector<8x16xi32>
    %213 = arith.extui %212 : vector<8x16xi1> to vector<8x16xi32>
    %214 = arith.sitofp %213 : vector<8x16xi32> to vector<8x16xf32>
    %215 = arith.mulf %2, %214 : vector<8x16xf32>
    %cst_27 = arith.constant dense<0.000000e+00> : vector<8xf32>
    %216 = vector.multi_reduction <add>, %215, %cst_27 [1] : vector<8x16xf32> to vector<8xf32>
    %217 = vector.shape_cast %216 : vector<8xf32> to vector<8x1xf32>
    %218 = vector.broadcast %217 : vector<8x1xf32> to vector<8x128xf32>
    %219 = arith.mulf %218, %7 : vector<8x128xf32>
    %220 = arith.addf %219, %11 : vector<8x128xf32>
    %221 = arith.addf %210, %220 : vector<8x128xf32>
    %cst_28 = arith.constant dense<0.000000e+00> : vector<8x512xf32>
    %222 = tpu.matmul %221, %0, %cst_28 {dimension_numbers = #tpu.dot_dimension_numbers<[1], [0], [0], [1], [0, 0, 1, 1], [], []>} : vector<8x128xf32>, vector<128x512xf32>, vector<8x512xf32> -> vector<8x512xf32>
    %223 = vector.extract_strided_slice %222 {offsets = [0, 0], sizes = [8, 384], strides = [1, 1]} : vector<8x512xf32> to vector<8x384xf32>
    %224 = arith.negf %223 : vector<8x384xf32>
    %225 = math.exp %224 : vector<8x384xf32>
    %cst_29 = arith.constant 1.000000e+00 : f32
    %226 = vector.broadcast %cst_29 : f32 to vector<8x384xf32>
    %227 = arith.addf %226, %225 : vector<8x384xf32>
    %228 = arith.divf %226, %227 : vector<8x384xf32>
    %229 = vector.extract_strided_slice %222 {offsets = [0, 384], sizes = [8, 128], strides = [1, 1]} : vector<8x512xf32> to vector<8x128xf32>
    %230 = math.tanh %229 : vector<8x128xf32>
    %231 = vector.extract_strided_slice %228 {offsets = [0, 0], sizes = [8, 128], strides = [1, 1]} : vector<8x384xf32> to vector<8x128xf32>
    %232 = vector.extract_strided_slice %228 {offsets = [0, 128], sizes = [8, 128], strides = [1, 1]} : vector<8x384xf32> to vector<8x128xf32>
    %233 = vector.extract_strided_slice %228 {offsets = [0, 256], sizes = [8, 128], strides = [1, 1]} : vector<8x384xf32> to vector<8x128xf32>
    %234 = arith.mulf %232, %208 : vector<8x128xf32>
    %235 = arith.mulf %231, %230 : vector<8x128xf32>
    %236 = arith.addf %234, %235 : vector<8x128xf32>
    %237 = math.tanh %236 : vector<8x128xf32>
    %238 = arith.mulf %233, %237 : vector<8x128xf32>
    %c8_i32 = arith.constant 8 : i32
    %239 = vector.broadcast %c8_i32 : i32 to vector<8x16xi32>
    %240 = arith.cmpi eq, %12, %239 : vector<8x16xi32>
    %241 = arith.extui %240 : vector<8x16xi1> to vector<8x16xi32>
    %242 = arith.sitofp %241 : vector<8x16xi32> to vector<8x16xf32>
    %243 = arith.mulf %2, %242 : vector<8x16xf32>
    %cst_30 = arith.constant dense<0.000000e+00> : vector<8xf32>
    %244 = vector.multi_reduction <add>, %243, %cst_30 [1] : vector<8x16xf32> to vector<8xf32>
    %245 = vector.shape_cast %244 : vector<8xf32> to vector<8x1xf32>
    %246 = vector.broadcast %245 : vector<8x1xf32> to vector<8x128xf32>
    %247 = arith.mulf %246, %7 : vector<8x128xf32>
    %248 = arith.addf %247, %11 : vector<8x128xf32>
    %249 = arith.addf %238, %248 : vector<8x128xf32>
    %cst_31 = arith.constant dense<0.000000e+00> : vector<8x512xf32>
    %250 = tpu.matmul %249, %0, %cst_31 {dimension_numbers = #tpu.dot_dimension_numbers<[1], [0], [0], [1], [0, 0, 1, 1], [], []>} : vector<8x128xf32>, vector<128x512xf32>, vector<8x512xf32> -> vector<8x512xf32>
    %251 = vector.extract_strided_slice %250 {offsets = [0, 0], sizes = [8, 384], strides = [1, 1]} : vector<8x512xf32> to vector<8x384xf32>
    %252 = arith.negf %251 : vector<8x384xf32>
    %253 = math.exp %252 : vector<8x384xf32>
    %cst_32 = arith.constant 1.000000e+00 : f32
    %254 = vector.broadcast %cst_32 : f32 to vector<8x384xf32>
    %255 = arith.addf %254, %253 : vector<8x384xf32>
    %256 = arith.divf %254, %255 : vector<8x384xf32>
    %257 = vector.extract_strided_slice %250 {offsets = [0, 384], sizes = [8, 128], strides = [1, 1]} : vector<8x512xf32> to vector<8x128xf32>
    %258 = math.tanh %257 : vector<8x128xf32>
    %259 = vector.extract_strided_slice %256 {offsets = [0, 0], sizes = [8, 128], strides = [1, 1]} : vector<8x384xf32> to vector<8x128xf32>
    %260 = vector.extract_strided_slice %256 {offsets = [0, 128], sizes = [8, 128], strides = [1, 1]} : vector<8x384xf32> to vector<8x128xf32>
    %261 = vector.extract_strided_slice %256 {offsets = [0, 256], sizes = [8, 128], strides = [1, 1]} : vector<8x384xf32> to vector<8x128xf32>
    %262 = arith.mulf %260, %236 : vector<8x128xf32>
    %263 = arith.mulf %259, %258 : vector<8x128xf32>
    %264 = arith.addf %262, %263 : vector<8x128xf32>
    %265 = math.tanh %264 : vector<8x128xf32>
    %266 = arith.mulf %261, %265 : vector<8x128xf32>
    %c9_i32 = arith.constant 9 : i32
    %267 = vector.broadcast %c9_i32 : i32 to vector<8x16xi32>
    %268 = arith.cmpi eq, %12, %267 : vector<8x16xi32>
    %269 = arith.extui %268 : vector<8x16xi1> to vector<8x16xi32>
    %270 = arith.sitofp %269 : vector<8x16xi32> to vector<8x16xf32>
    %271 = arith.mulf %2, %270 : vector<8x16xf32>
    %cst_33 = arith.constant dense<0.000000e+00> : vector<8xf32>
    %272 = vector.multi_reduction <add>, %271, %cst_33 [1] : vector<8x16xf32> to vector<8xf32>
    %273 = vector.shape_cast %272 : vector<8xf32> to vector<8x1xf32>
    %274 = vector.broadcast %273 : vector<8x1xf32> to vector<8x128xf32>
    %275 = arith.mulf %274, %7 : vector<8x128xf32>
    %276 = arith.addf %275, %11 : vector<8x128xf32>
    %277 = arith.addf %266, %276 : vector<8x128xf32>
    %cst_34 = arith.constant dense<0.000000e+00> : vector<8x512xf32>
    %278 = tpu.matmul %277, %0, %cst_34 {dimension_numbers = #tpu.dot_dimension_numbers<[1], [0], [0], [1], [0, 0, 1, 1], [], []>} : vector<8x128xf32>, vector<128x512xf32>, vector<8x512xf32> -> vector<8x512xf32>
    %279 = vector.extract_strided_slice %278 {offsets = [0, 0], sizes = [8, 384], strides = [1, 1]} : vector<8x512xf32> to vector<8x384xf32>
    %280 = arith.negf %279 : vector<8x384xf32>
    %281 = math.exp %280 : vector<8x384xf32>
    %cst_35 = arith.constant 1.000000e+00 : f32
    %282 = vector.broadcast %cst_35 : f32 to vector<8x384xf32>
    %283 = arith.addf %282, %281 : vector<8x384xf32>
    %284 = arith.divf %282, %283 : vector<8x384xf32>
    %285 = vector.extract_strided_slice %278 {offsets = [0, 384], sizes = [8, 128], strides = [1, 1]} : vector<8x512xf32> to vector<8x128xf32>
    %286 = math.tanh %285 : vector<8x128xf32>
    %287 = vector.extract_strided_slice %284 {offsets = [0, 0], sizes = [8, 128], strides = [1, 1]} : vector<8x384xf32> to vector<8x128xf32>
    %288 = vector.extract_strided_slice %284 {offsets = [0, 128], sizes = [8, 128], strides = [1, 1]} : vector<8x384xf32> to vector<8x128xf32>
    %289 = vector.extract_strided_slice %284 {offsets = [0, 256], sizes = [8, 128], strides = [1, 1]} : vector<8x384xf32> to vector<8x128xf32>
    %290 = arith.mulf %288, %264 : vector<8x128xf32>
    %291 = arith.mulf %287, %286 : vector<8x128xf32>
    %292 = arith.addf %290, %291 : vector<8x128xf32>
    %293 = math.tanh %292 : vector<8x128xf32>
    %294 = arith.mulf %289, %293 : vector<8x128xf32>
    %c10_i32 = arith.constant 10 : i32
    %295 = vector.broadcast %c10_i32 : i32 to vector<8x16xi32>
    %296 = arith.cmpi eq, %12, %295 : vector<8x16xi32>
    %297 = arith.extui %296 : vector<8x16xi1> to vector<8x16xi32>
    %298 = arith.sitofp %297 : vector<8x16xi32> to vector<8x16xf32>
    %299 = arith.mulf %2, %298 : vector<8x16xf32>
    %cst_36 = arith.constant dense<0.000000e+00> : vector<8xf32>
    %300 = vector.multi_reduction <add>, %299, %cst_36 [1] : vector<8x16xf32> to vector<8xf32>
    %301 = vector.shape_cast %300 : vector<8xf32> to vector<8x1xf32>
    %302 = vector.broadcast %301 : vector<8x1xf32> to vector<8x128xf32>
    %303 = arith.mulf %302, %7 : vector<8x128xf32>
    %304 = arith.addf %303, %11 : vector<8x128xf32>
    %305 = arith.addf %294, %304 : vector<8x128xf32>
    %cst_37 = arith.constant dense<0.000000e+00> : vector<8x512xf32>
    %306 = tpu.matmul %305, %0, %cst_37 {dimension_numbers = #tpu.dot_dimension_numbers<[1], [0], [0], [1], [0, 0, 1, 1], [], []>} : vector<8x128xf32>, vector<128x512xf32>, vector<8x512xf32> -> vector<8x512xf32>
    %307 = vector.extract_strided_slice %306 {offsets = [0, 0], sizes = [8, 384], strides = [1, 1]} : vector<8x512xf32> to vector<8x384xf32>
    %308 = arith.negf %307 : vector<8x384xf32>
    %309 = math.exp %308 : vector<8x384xf32>
    %cst_38 = arith.constant 1.000000e+00 : f32
    %310 = vector.broadcast %cst_38 : f32 to vector<8x384xf32>
    %311 = arith.addf %310, %309 : vector<8x384xf32>
    %312 = arith.divf %310, %311 : vector<8x384xf32>
    %313 = vector.extract_strided_slice %306 {offsets = [0, 384], sizes = [8, 128], strides = [1, 1]} : vector<8x512xf32> to vector<8x128xf32>
    %314 = math.tanh %313 : vector<8x128xf32>
    %315 = vector.extract_strided_slice %312 {offsets = [0, 0], sizes = [8, 128], strides = [1, 1]} : vector<8x384xf32> to vector<8x128xf32>
    %316 = vector.extract_strided_slice %312 {offsets = [0, 128], sizes = [8, 128], strides = [1, 1]} : vector<8x384xf32> to vector<8x128xf32>
    %317 = vector.extract_strided_slice %312 {offsets = [0, 256], sizes = [8, 128], strides = [1, 1]} : vector<8x384xf32> to vector<8x128xf32>
    %318 = arith.mulf %316, %292 : vector<8x128xf32>
    %319 = arith.mulf %315, %314 : vector<8x128xf32>
    %320 = arith.addf %318, %319 : vector<8x128xf32>
    %321 = math.tanh %320 : vector<8x128xf32>
    %322 = arith.mulf %317, %321 : vector<8x128xf32>
    %c11_i32 = arith.constant 11 : i32
    %323 = vector.broadcast %c11_i32 : i32 to vector<8x16xi32>
    %324 = arith.cmpi eq, %12, %323 : vector<8x16xi32>
    %325 = arith.extui %324 : vector<8x16xi1> to vector<8x16xi32>
    %326 = arith.sitofp %325 : vector<8x16xi32> to vector<8x16xf32>
    %327 = arith.mulf %2, %326 : vector<8x16xf32>
    %cst_39 = arith.constant dense<0.000000e+00> : vector<8xf32>
    %328 = vector.multi_reduction <add>, %327, %cst_39 [1] : vector<8x16xf32> to vector<8xf32>
    %329 = vector.shape_cast %328 : vector<8xf32> to vector<8x1xf32>
    %330 = vector.broadcast %329 : vector<8x1xf32> to vector<8x128xf32>
    %331 = arith.mulf %330, %7 : vector<8x128xf32>
    %332 = arith.addf %331, %11 : vector<8x128xf32>
    %333 = arith.addf %322, %332 : vector<8x128xf32>
    %cst_40 = arith.constant dense<0.000000e+00> : vector<8x512xf32>
    %334 = tpu.matmul %333, %0, %cst_40 {dimension_numbers = #tpu.dot_dimension_numbers<[1], [0], [0], [1], [0, 0, 1, 1], [], []>} : vector<8x128xf32>, vector<128x512xf32>, vector<8x512xf32> -> vector<8x512xf32>
    %335 = vector.extract_strided_slice %334 {offsets = [0, 0], sizes = [8, 384], strides = [1, 1]} : vector<8x512xf32> to vector<8x384xf32>
    %336 = arith.negf %335 : vector<8x384xf32>
    %337 = math.exp %336 : vector<8x384xf32>
    %cst_41 = arith.constant 1.000000e+00 : f32
    %338 = vector.broadcast %cst_41 : f32 to vector<8x384xf32>
    %339 = arith.addf %338, %337 : vector<8x384xf32>
    %340 = arith.divf %338, %339 : vector<8x384xf32>
    %341 = vector.extract_strided_slice %334 {offsets = [0, 384], sizes = [8, 128], strides = [1, 1]} : vector<8x512xf32> to vector<8x128xf32>
    %342 = math.tanh %341 : vector<8x128xf32>
    %343 = vector.extract_strided_slice %340 {offsets = [0, 0], sizes = [8, 128], strides = [1, 1]} : vector<8x384xf32> to vector<8x128xf32>
    %344 = vector.extract_strided_slice %340 {offsets = [0, 128], sizes = [8, 128], strides = [1, 1]} : vector<8x384xf32> to vector<8x128xf32>
    %345 = vector.extract_strided_slice %340 {offsets = [0, 256], sizes = [8, 128], strides = [1, 1]} : vector<8x384xf32> to vector<8x128xf32>
    %346 = arith.mulf %344, %320 : vector<8x128xf32>
    %347 = arith.mulf %343, %342 : vector<8x128xf32>
    %348 = arith.addf %346, %347 : vector<8x128xf32>
    %349 = math.tanh %348 : vector<8x128xf32>
    %350 = arith.mulf %345, %349 : vector<8x128xf32>
    %c12_i32 = arith.constant 12 : i32
    %351 = vector.broadcast %c12_i32 : i32 to vector<8x16xi32>
    %352 = arith.cmpi eq, %12, %351 : vector<8x16xi32>
    %353 = arith.extui %352 : vector<8x16xi1> to vector<8x16xi32>
    %354 = arith.sitofp %353 : vector<8x16xi32> to vector<8x16xf32>
    %355 = arith.mulf %2, %354 : vector<8x16xf32>
    %cst_42 = arith.constant dense<0.000000e+00> : vector<8xf32>
    %356 = vector.multi_reduction <add>, %355, %cst_42 [1] : vector<8x16xf32> to vector<8xf32>
    %357 = vector.shape_cast %356 : vector<8xf32> to vector<8x1xf32>
    %358 = vector.broadcast %357 : vector<8x1xf32> to vector<8x128xf32>
    %359 = arith.mulf %358, %7 : vector<8x128xf32>
    %360 = arith.addf %359, %11 : vector<8x128xf32>
    %361 = arith.addf %350, %360 : vector<8x128xf32>
    %cst_43 = arith.constant dense<0.000000e+00> : vector<8x512xf32>
    %362 = tpu.matmul %361, %0, %cst_43 {dimension_numbers = #tpu.dot_dimension_numbers<[1], [0], [0], [1], [0, 0, 1, 1], [], []>} : vector<8x128xf32>, vector<128x512xf32>, vector<8x512xf32> -> vector<8x512xf32>
    %363 = vector.extract_strided_slice %362 {offsets = [0, 0], sizes = [8, 384], strides = [1, 1]} : vector<8x512xf32> to vector<8x384xf32>
    %364 = arith.negf %363 : vector<8x384xf32>
    %365 = math.exp %364 : vector<8x384xf32>
    %cst_44 = arith.constant 1.000000e+00 : f32
    %366 = vector.broadcast %cst_44 : f32 to vector<8x384xf32>
    %367 = arith.addf %366, %365 : vector<8x384xf32>
    %368 = arith.divf %366, %367 : vector<8x384xf32>
    %369 = vector.extract_strided_slice %362 {offsets = [0, 384], sizes = [8, 128], strides = [1, 1]} : vector<8x512xf32> to vector<8x128xf32>
    %370 = math.tanh %369 : vector<8x128xf32>
    %371 = vector.extract_strided_slice %368 {offsets = [0, 0], sizes = [8, 128], strides = [1, 1]} : vector<8x384xf32> to vector<8x128xf32>
    %372 = vector.extract_strided_slice %368 {offsets = [0, 128], sizes = [8, 128], strides = [1, 1]} : vector<8x384xf32> to vector<8x128xf32>
    %373 = vector.extract_strided_slice %368 {offsets = [0, 256], sizes = [8, 128], strides = [1, 1]} : vector<8x384xf32> to vector<8x128xf32>
    %374 = arith.mulf %372, %348 : vector<8x128xf32>
    %375 = arith.mulf %371, %370 : vector<8x128xf32>
    %376 = arith.addf %374, %375 : vector<8x128xf32>
    %377 = math.tanh %376 : vector<8x128xf32>
    %378 = arith.mulf %373, %377 : vector<8x128xf32>
    %c13_i32 = arith.constant 13 : i32
    %379 = vector.broadcast %c13_i32 : i32 to vector<8x16xi32>
    %380 = arith.cmpi eq, %12, %379 : vector<8x16xi32>
    %381 = arith.extui %380 : vector<8x16xi1> to vector<8x16xi32>
    %382 = arith.sitofp %381 : vector<8x16xi32> to vector<8x16xf32>
    %383 = arith.mulf %2, %382 : vector<8x16xf32>
    %cst_45 = arith.constant dense<0.000000e+00> : vector<8xf32>
    %384 = vector.multi_reduction <add>, %383, %cst_45 [1] : vector<8x16xf32> to vector<8xf32>
    %385 = vector.shape_cast %384 : vector<8xf32> to vector<8x1xf32>
    %386 = vector.broadcast %385 : vector<8x1xf32> to vector<8x128xf32>
    %387 = arith.mulf %386, %7 : vector<8x128xf32>
    %388 = arith.addf %387, %11 : vector<8x128xf32>
    %389 = arith.addf %378, %388 : vector<8x128xf32>
    %cst_46 = arith.constant dense<0.000000e+00> : vector<8x512xf32>
    %390 = tpu.matmul %389, %0, %cst_46 {dimension_numbers = #tpu.dot_dimension_numbers<[1], [0], [0], [1], [0, 0, 1, 1], [], []>} : vector<8x128xf32>, vector<128x512xf32>, vector<8x512xf32> -> vector<8x512xf32>
    %391 = vector.extract_strided_slice %390 {offsets = [0, 0], sizes = [8, 384], strides = [1, 1]} : vector<8x512xf32> to vector<8x384xf32>
    %392 = arith.negf %391 : vector<8x384xf32>
    %393 = math.exp %392 : vector<8x384xf32>
    %cst_47 = arith.constant 1.000000e+00 : f32
    %394 = vector.broadcast %cst_47 : f32 to vector<8x384xf32>
    %395 = arith.addf %394, %393 : vector<8x384xf32>
    %396 = arith.divf %394, %395 : vector<8x384xf32>
    %397 = vector.extract_strided_slice %390 {offsets = [0, 384], sizes = [8, 128], strides = [1, 1]} : vector<8x512xf32> to vector<8x128xf32>
    %398 = math.tanh %397 : vector<8x128xf32>
    %399 = vector.extract_strided_slice %396 {offsets = [0, 0], sizes = [8, 128], strides = [1, 1]} : vector<8x384xf32> to vector<8x128xf32>
    %400 = vector.extract_strided_slice %396 {offsets = [0, 128], sizes = [8, 128], strides = [1, 1]} : vector<8x384xf32> to vector<8x128xf32>
    %401 = vector.extract_strided_slice %396 {offsets = [0, 256], sizes = [8, 128], strides = [1, 1]} : vector<8x384xf32> to vector<8x128xf32>
    %402 = arith.mulf %400, %376 : vector<8x128xf32>
    %403 = arith.mulf %399, %398 : vector<8x128xf32>
    %404 = arith.addf %402, %403 : vector<8x128xf32>
    %405 = math.tanh %404 : vector<8x128xf32>
    %406 = arith.mulf %401, %405 : vector<8x128xf32>
    %c14_i32 = arith.constant 14 : i32
    %407 = vector.broadcast %c14_i32 : i32 to vector<8x16xi32>
    %408 = arith.cmpi eq, %12, %407 : vector<8x16xi32>
    %409 = arith.extui %408 : vector<8x16xi1> to vector<8x16xi32>
    %410 = arith.sitofp %409 : vector<8x16xi32> to vector<8x16xf32>
    %411 = arith.mulf %2, %410 : vector<8x16xf32>
    %cst_48 = arith.constant dense<0.000000e+00> : vector<8xf32>
    %412 = vector.multi_reduction <add>, %411, %cst_48 [1] : vector<8x16xf32> to vector<8xf32>
    %413 = vector.shape_cast %412 : vector<8xf32> to vector<8x1xf32>
    %414 = vector.broadcast %413 : vector<8x1xf32> to vector<8x128xf32>
    %415 = arith.mulf %414, %7 : vector<8x128xf32>
    %416 = arith.addf %415, %11 : vector<8x128xf32>
    %417 = arith.addf %406, %416 : vector<8x128xf32>
    %cst_49 = arith.constant dense<0.000000e+00> : vector<8x512xf32>
    %418 = tpu.matmul %417, %0, %cst_49 {dimension_numbers = #tpu.dot_dimension_numbers<[1], [0], [0], [1], [0, 0, 1, 1], [], []>} : vector<8x128xf32>, vector<128x512xf32>, vector<8x512xf32> -> vector<8x512xf32>
    %419 = vector.extract_strided_slice %418 {offsets = [0, 0], sizes = [8, 384], strides = [1, 1]} : vector<8x512xf32> to vector<8x384xf32>
    %420 = arith.negf %419 : vector<8x384xf32>
    %421 = math.exp %420 : vector<8x384xf32>
    %cst_50 = arith.constant 1.000000e+00 : f32
    %422 = vector.broadcast %cst_50 : f32 to vector<8x384xf32>
    %423 = arith.addf %422, %421 : vector<8x384xf32>
    %424 = arith.divf %422, %423 : vector<8x384xf32>
    %425 = vector.extract_strided_slice %418 {offsets = [0, 384], sizes = [8, 128], strides = [1, 1]} : vector<8x512xf32> to vector<8x128xf32>
    %426 = math.tanh %425 : vector<8x128xf32>
    %427 = vector.extract_strided_slice %424 {offsets = [0, 0], sizes = [8, 128], strides = [1, 1]} : vector<8x384xf32> to vector<8x128xf32>
    %428 = vector.extract_strided_slice %424 {offsets = [0, 128], sizes = [8, 128], strides = [1, 1]} : vector<8x384xf32> to vector<8x128xf32>
    %429 = vector.extract_strided_slice %424 {offsets = [0, 256], sizes = [8, 128], strides = [1, 1]} : vector<8x384xf32> to vector<8x128xf32>
    %430 = arith.mulf %428, %404 : vector<8x128xf32>
    %431 = arith.mulf %427, %426 : vector<8x128xf32>
    %432 = arith.addf %430, %431 : vector<8x128xf32>
    %433 = math.tanh %432 : vector<8x128xf32>
    %434 = arith.mulf %429, %433 : vector<8x128xf32>
    %c15_i32 = arith.constant 15 : i32
    %435 = vector.broadcast %c15_i32 : i32 to vector<8x16xi32>
    %436 = arith.cmpi eq, %12, %435 : vector<8x16xi32>
    %437 = arith.extui %436 : vector<8x16xi1> to vector<8x16xi32>
    %438 = arith.sitofp %437 : vector<8x16xi32> to vector<8x16xf32>
    %439 = arith.mulf %2, %438 : vector<8x16xf32>
    %cst_51 = arith.constant dense<0.000000e+00> : vector<8xf32>
    %440 = vector.multi_reduction <add>, %439, %cst_51 [1] : vector<8x16xf32> to vector<8xf32>
    %441 = vector.shape_cast %440 : vector<8xf32> to vector<8x1xf32>
    %442 = vector.broadcast %441 : vector<8x1xf32> to vector<8x128xf32>
    %443 = arith.mulf %442, %7 : vector<8x128xf32>
    %444 = arith.addf %443, %11 : vector<8x128xf32>
    %445 = arith.addf %434, %444 : vector<8x128xf32>
    %cst_52 = arith.constant dense<0.000000e+00> : vector<8x512xf32>
    %446 = tpu.matmul %445, %0, %cst_52 {dimension_numbers = #tpu.dot_dimension_numbers<[1], [0], [0], [1], [0, 0, 1, 1], [], []>} : vector<8x128xf32>, vector<128x512xf32>, vector<8x512xf32> -> vector<8x512xf32>
    %447 = vector.extract_strided_slice %446 {offsets = [0, 0], sizes = [8, 384], strides = [1, 1]} : vector<8x512xf32> to vector<8x384xf32>
    %448 = arith.negf %447 : vector<8x384xf32>
    %449 = math.exp %448 : vector<8x384xf32>
    %cst_53 = arith.constant 1.000000e+00 : f32
    %450 = vector.broadcast %cst_53 : f32 to vector<8x384xf32>
    %451 = arith.addf %450, %449 : vector<8x384xf32>
    %452 = arith.divf %450, %451 : vector<8x384xf32>
    %453 = vector.extract_strided_slice %446 {offsets = [0, 384], sizes = [8, 128], strides = [1, 1]} : vector<8x512xf32> to vector<8x128xf32>
    %454 = math.tanh %453 : vector<8x128xf32>
    %455 = vector.extract_strided_slice %452 {offsets = [0, 0], sizes = [8, 128], strides = [1, 1]} : vector<8x384xf32> to vector<8x128xf32>
    %456 = vector.extract_strided_slice %452 {offsets = [0, 128], sizes = [8, 128], strides = [1, 1]} : vector<8x384xf32> to vector<8x128xf32>
    %457 = vector.extract_strided_slice %452 {offsets = [0, 256], sizes = [8, 128], strides = [1, 1]} : vector<8x384xf32> to vector<8x128xf32>
    %458 = arith.mulf %456, %432 : vector<8x128xf32>
    %459 = arith.mulf %455, %454 : vector<8x128xf32>
    %460 = arith.addf %458, %459 : vector<8x128xf32>
    %461 = math.tanh %460 : vector<8x128xf32>
    %462 = arith.mulf %457, %461 : vector<8x128xf32>
    %463 = vector.broadcast %1 : vector<1x128xf32> to vector<8x128xf32>
    %464 = arith.mulf %462, %463 : vector<8x128xf32>
    %cst_54 = arith.constant dense<0.000000e+00> : vector<8xf32>
    %465 = vector.multi_reduction <add>, %464, %cst_54 [1] : vector<8x128xf32> to vector<8xf32>
    %466 = vector.shape_cast %465 : vector<8xf32> to vector<8x1xf32>
    %c0_55 = arith.constant 0 : index
    %c0_56 = arith.constant 0 : index
    %467 = memref.load %arg3[%c0_55, %c0_56] : memref<1x1xf32, #tpu.memory_space<smem>>
    %468 = vector.broadcast %467 : f32 to vector<8x1xf32>
    %469 = arith.addf %466, %468 : vector<8x1xf32>
    %470 = arith.negf %469 : vector<8x1xf32>
    %471 = math.exp %470 : vector<8x1xf32>
    %cst_57 = arith.constant 1.000000e+00 : f32
    %472 = vector.broadcast %cst_57 : f32 to vector<8x1xf32>
    %473 = arith.addf %472, %471 : vector<8x1xf32>
    %474 = arith.divf %472, %473 : vector<8x1xf32>
    %475 = vector.shape_cast %474 : vector<8x1xf32> to vector<8x1xf32>
    %476 = vector.broadcast %475 : vector<8x1xf32> to vector<8x128xf32>
    %c0_58 = arith.constant 0 : index
    %c0_59 = arith.constant 0 : index
    %477 = vector.load %arg4[%c0_58, %c0_59] : memref<8x128xf32, #tpu.memory_space<vmem>>, vector<8x128xf32>
    tpu.vector_store %arg4[%c0_58, %c0_59], %476 {strides = array<i32>} : memref<8x128xf32, #tpu.memory_space<vmem>>, vector<8x128xf32>,
    return
  }
}

</mosaic_0001>

<bundles_post_ra>
// kernel: _forward_impl.1
= control target key start
LH: loop header
LB: loop body
LE: loop exit
PB: predicated region body
PF: predicated region fallthrough
CT: control target
= control target key end

     0   :  { %10 = vsyncpa [#allocation4], 0  ;;  %s4329_s15 = smov [#allocation3]   ;;  %s5164_s0 = inlined_call_operand.vmem [shape: f32[8,16], index: 0, kind: input, shape index: {}]   ;;  %s5165_s1 = inlined_call_operand.hbm [shape: f32[128,512], index: 1, kind: input, shape index: {}]   ;;  %s5166_s2 = inlined_call_operand.vmem [shape: f32[1,128], index: 2, kind: input, shape index: {}]   ;;  %s5167_s3 = inlined_call_operand.<no memory space> [shape: f32[1,1], index: 3, kind: input, shape index: {}]   ;;  %s5168_s4 = inlined_call_operand.vmem [shape: f32[8,128], index: 4, kind: output, shape index: {}]  }
   0x1   :  { %s18_s16 = sshll.u32 %s4329_s15, 4  ;;  %s4305_s19 = scalar_lea.hbm %s5165_s1, 8192  ;;  %s19_s16 = int_to_ptr.vmem [resolvable:$true] %s18_s16 }
   0x2   :  { %p4306_p0 = scmp.ne.s32.totalorder %s5165_s1, %s4305_s19  ;;  %p4309_p1 = scmp.lt.u32.totalorder %s4305_s19, %s5165_s1 }
   0x4   :  { %p4311_p2 = pnand %p4309_p1, %p4306_p0 }
   0x6   :  { %4314 = shalt.err (!%p4311_p2)
}
   0x7   :  { %s4315_s24 = scalar_lea.vmem %s19_s16, 8192  ;;  %p4320_p4 = scmp.lt.s32.totalorder %s19_s16, %s19_s16 }
   0x8   :  { %p4316_p3 = scmp.ne.s32.totalorder %s19_s16, %s4315_s24  ;;  %p4321_p5 = scmp.lt.s32.totalorder %s4315_s24, %s4315_s24 }
   0xa   :  { %p4322_p6 = por %p4321_p5, %p4320_p4 }
   0xc   :  { %p4323_p7 = pnand %p4322_p6, %p4316_p3 }
   0xe   :  { %4326 = shalt.err (!%p4323_p7)
}
   0xf   :  { %s4330_s25 = smov 512   ;;  %s4331_s26 = smov 32  }
  0x10   :  { %24 = dma.hbm_to_vmem [thread:$0]  %s5165_s1, 8192, %s19_s16, [#allocation4], %s4330_s25, %s4330_s25, %s4331_s26  }
  0x11   :  { %4327 = dma.done.wait [#allocation4], 8192  }
  0x12   :  { %4328 = vsyncadd [#allocation4], 4294959104  ;;  %v98_v0 = vlaneseq  ;;  %v4332_v1 = vmov 0.0   ;;  %v4379_v4 = vld [vmem:[%s5164_s0] sm:$0xff]  ;;  %vm110_vm1 = vcmask 130048   ;;  %v33_v5 = vld [vmem:[#allocation3 + $0x8] sm:$0xff] }
  0x13   :  { %181 = vmatprep.mubr.f32.mxu0 %v4332_v1  ;;  %252 = vmatprep.mubr.f32.mxu1 %v4332_v1  ;;  %v37_v6 = vld [vmem:[#allocation3 + $0x28] sm:$0xff]  ;;  %v35_v9 = vld [vmem:[#allocation3 + $0x18] sm:$0xff]  ;;  %v32_v11 = vld [vmem:[#allocation3] sm:$0xff] }
  0x14   :  { %v4372_v2 = vand.u32 127, %v98_v0  ;;  %v4382_v8 = vpack.c.bf16 %v37_v6, %v33_v5  ;;  %v39_v10 = vld [vmem:[#allocation3 + $0x38] sm:$0xff]  ;;  %v36_v13 = vld [vmem:[#allocation3 + $0x20] sm:$0xff]  ;;  %v34_v14 = vld [vmem:[#allocation3 + $0x10] sm:$0xff] }
  0x15   :  { %v4384_v12 = vpack.c.bf16 %v39_v10, %v35_v9  ;;  %v38_v15 = vld [vmem:[#allocation3 + $0x30] sm:$0xff]  ;;  %v4388_v17 = vpack.c.bf16 %v36_v13, %v32_v11  ;;  %v41_v19 = vld [vmem:[#allocation3 + $0x48] sm:$0xff]  ;;  %v43_v21 = vld [vmem:[#allocation3 + $0x58] sm:$0xff] }
  0x16   :  { %vm106_vm0 = vcmp.eq.s32.totalorder %v4372_v2, 0  ;;  %3016 = vmatprep.subr.bf16.mxu0 %v4382_v8  ;;  %v4390_v18 = vpack.c.bf16 %v38_v15, %v34_v14  ;;  %v45_v20 = vld [vmem:[#allocation3 + $0x68] sm:$0xff]  ;;  %v47_v23 = vld [vmem:[#allocation3 + $0x78] sm:$0xff]  ;;  %v40_v24 = vld [vmem:[#allocation3 + $0x40] sm:$0xff]  ;;  %vm283_vm2 = vcmp.eq.s32.totalorder %v4372_v2, 1  ;;  %vm100_vm3 = vcmp.eq.s32.totalorder %v4372_v2, 64 }
  0x17   :  { %v2949_v3 = vsel %vm106_vm0, 1.0, %v4332_v1  ;;  %3048 = vmatprep.subr.bf16.mxu1 %v4384_v12  ;;  %v4393_v22 = vpack.c.bf16 %v45_v20, %v41_v19  ;;  %v44_v25 = vld [vmem:[#allocation3 + $0x60] sm:$0xff]  ;;  %3018 = vmatpush1.bf16.msra.mxu0 %v4388_v17  ;;  %v4397_v26 = vpack.c.bf16 %v47_v23, %v43_v21  ;;  %v42_v28 = vld [vmem:[#allocation3 + $0x50] sm:$0xff]  ;;  %v49_v30 = vld [vmem:[#allocation3 + $0x88] sm:$0xff]  ;;  %vm103_vm4 = vcmp.eq.s32.totalorder %v4372_v2, 65 }
  0x18   :  { %v109_v7 = vmul.f32 %v2949_v3, %v4379_v4  ;;  %3050 = vmatpush1.bf16.msra.mxu1 %v4390_v18  ;;  %v4399_v27 = vpack.c.bf16 %v44_v25, %v40_v24  ;;  %v46_v29 = vld [vmem:[#allocation3 + $0x70] sm:$0xff]  ;;  %v53_v32 = vld [vmem:[#allocation3 + $0xa8] sm:$0xff]  ;;  %v51_v33 = vld [vmem:[#allocation3 + $0x98] sm:$0xff]  ;;  %vm459_vm5 = vcmp.eq.s32.totalorder %v4372_v2, 2  ;;  %vm635_vm6 = vcmp.eq.s32.totalorder %v4372_v2, 3 }
  0x19   :  { %3020 = vmatprep.subr.bf16.mxu0 %v4393_v22  ;;  %v4402_v31 = vpack.c.bf16 %v46_v29, %v42_v28  ;;  %v55_v34 = vld [vmem:[#allocation3 + $0xb8] sm:$0xff]  ;;  %3052 = vmatprep.subr.bf16.mxu1 %v4397_v26  ;;  %v4405_v35 = vpack.c.bf16 %v53_v32, %v49_v30  ;;  %v48_v37 = vld [vmem:[#allocation3 + $0x80] sm:$0xff]  ;;  %v50_v39 = vld [vmem:[#allocation3 + $0x90] sm:$0xff]  ;;  %vm811_vm7 = vcmp.eq.s32.totalorder %v4372_v2, 4  ;;  %vm987_vm8 = vcmp.eq.s32.totalorder %v4372_v2, 5 }
  0x1a   :  { %v111_v16 = vsel %vm110_vm1, %v109_v7, 0.0  ;;  %v4407_v36 = vpack.c.bf16 %v55_v34, %v51_v33  ;;  %v52_v38 = vld [vmem:[#allocation3 + $0xa0] sm:$0xff]  ;;  %v54_v40 = vld [vmem:[#allocation3 + $0xb0] sm:$0xff]  ;;  %v57_v41 = vld [vmem:[#allocation3 + $0xc8] sm:$0xff]  ;;  %vm1163_vm9 = vcmp.eq.s32.totalorder %v4372_v2, 6  ;;  %vm1339_vm10 = vcmp.eq.s32.totalorder %v4372_v2, 7 }
  0x1b   :  { %112 = vadd.xlane.f32.xlu0 %v111_v16  ;;  %v61_v42 = vld [vmem:[#allocation3 + $0xe8] sm:$0xff]  ;;  %3022 = vmatpush1.bf16.msra.mxu0 %v4399_v27  ;;  %v4411_v43 = vpack.c.bf16 %v52_v38, %v48_v37  ;;  %v4413_v44 = vpack.c.bf16 %v54_v40, %v50_v39  ;;  %v59_v45 = vld [vmem:[#allocation3 + $0xd8] sm:$0xff]  ;;  %v56_v47 = vld [vmem:[#allocation3 + $0xc0] sm:$0xff]  ;;  %vm1515_vm11 = vcmp.eq.s32.totalorder %v4372_v2, 8  ;;  %vm1691_vm12 = vcmp.eq.s32.totalorder %v4372_v2, 9 }
  0x1c   :  { %3054 = vmatpush1.bf16.msra.mxu1 %v4402_v31  ;;  %v63_v46 = vld [vmem:[#allocation3 + $0xf8] sm:$0xff]  ;;  %3024 = vmatprep.subr.bf16.mxu0 %v4405_v35  ;;  %v4417_v48 = vpack.c.bf16 %v61_v42, %v57_v41  ;;  %v60_v50 = vld [vmem:[#allocation3 + $0xe0] sm:$0xff]  ;;  %v58_v51 = vld [vmem:[#allocation3 + $0xd0] sm:$0xff]  ;;  %v2953_v42 = vsel %vm283_vm2, 1.0, %v4332_v1  ;;  %vm1867_vm13 = vcmp.eq.s32.totalorder %v4372_v2, 10  ;;  %vm2043_vm14 = vcmp.eq.s32.totalorder %v4372_v2, 11 }
  0x1d   :  { %3056 = vmatprep.subr.bf16.mxu1 %v4407_v36  ;;  %v4419_v49 = vpack.c.bf16 %v63_v46, %v59_v45  ;;  %v62_v52 = vld [vmem:[#allocation3 + $0xf0] sm:$0xff]  ;;  %v65_v53 = vld [vmem:[#allocation3 + $0x108] sm:$0xff]  ;;  %v67_v55 = vld [vmem:[#allocation3 + $0x118] sm:$0xff]  ;;  %v4423_v57 = vpack.c.bf16 %v60_v50, %v56_v47  ;;  %v286_v45 = vmul.f32 %v2953_v42, %v4379_v4  ;;  %vm2219_vm15 = vcmp.eq.s32.totalorder %v4372_v2, 12 }
  0x1e   :  { %v69_v54 = vld [vmem:[#allocation3 + $0x128] sm:$0xff]  ;;  %v71_v56 = vld [vmem:[#allocation3 + $0x138] sm:$0xff]  ;;  %v4425_v58 = vpack.c.bf16 %v62_v52, %v58_v51  ;;  %v64_v59 = vld [vmem:[#allocation3 + $0x100] sm:$0xff]  ;;  %vm2395_vm0 = vcmp.eq.s32.totalorder %v4372_v2, 13  ;;  %vm2571_vm2 = vcmp.eq.s32.totalorder %v4372_v2, 14 }
  0x1f   :  { %3026 = vmatpush1.bf16.msra.mxu0 %v4411_v43  ;;  %v68_v60 = vld [vmem:[#allocation3 + $0x120] sm:$0xff]  ;;  %v4429_v61 = vpack.c.bf16 %v69_v54, %v65_v53  ;;  %v4431_v62 = vpack.c.bf16 %v71_v56, %v67_v55  ;;  %v66_v63 = vld [vmem:[#allocation3 + $0x110] sm:$0xff]  ;;  %v73_v3 = vld [vmem:[#allocation3 + $0x148] sm:$0xff]  ;;  %v287_v56 = vsel %vm110_vm1, %v286_v45, 0.0 }
  0x20   :  { %3058 = vmatpush1.bf16.msra.mxu1 %v4413_v44  ;;  %3028 = vmatprep.subr.bf16.mxu0 %v4417_v48  ;;  %v70_v0 = vld [vmem:[#allocation3 + $0x130] sm:$0xff]  ;;  %v77_v5 = vld [vmem:[#allocation3 + $0x168] sm:$0xff]  ;;  %v75_v6 = vld [vmem:[#allocation3 + $0x158] sm:$0xff]  ;;  %v4435_v9 = vpack.c.bf16 %v68_v60, %v64_v59 }
  0x21   :  { %3060 = vmatprep.subr.bf16.mxu1 %v4419_v49  ;;  %v79_v7 = vld [vmem:[#allocation3 + $0x178] sm:$0xff]  ;;  %v4437_v10 = vpack.c.bf16 %v70_v0, %v66_v63  ;;  %v72_v11 = vld [vmem:[#allocation3 + $0x140] sm:$0xff]  ;;  %v4441_v14 = vpack.c.bf16 %v77_v5, %v73_v3  ;;  %v74_v16 = vld [vmem:[#allocation3 + $0x150] sm:$0xff]  ;;  %288 = vadd.xlane.f32.xlu0 %v287_v56  ;;  %v4488_v63 = vsel %vm100_vm3, 1.0, %v4332_v1  ;;  %v4491_v0 = vsel %vm103_vm4, 1.0, %v4332_v1 }
  0x22   :  { %v76_v13 = vld [vmem:[#allocation3 + $0x160] sm:$0xff]  ;;  %v4443_v15 = vpack.c.bf16 %v79_v7, %v75_v6  ;;  %v78_v19 = vld [vmem:[#allocation3 + $0x170] sm:$0xff]  ;;  %v81_v20 = vld [vmem:[#allocation3 + $0x188] sm:$0xff]  ;;  %v2957_v7 = vsel %vm459_vm5, 1.0, %v4332_v1  ;;  %vm2747_vm3 = vcmp.eq.s32.totalorder %v4372_v2, 15 }
  0x23   :  { %3030 = vmatpush1.bf16.msra.mxu0 %v4423_v57  ;;  %v85_v21 = vld [vmem:[#allocation3 + $0x1a8] sm:$0xff]  ;;  %v83_v23 = vld [vmem:[#allocation3 + $0x198] sm:$0xff]  ;;  %v4447_v25 = vpack.c.bf16 %v76_v13, %v72_v11  ;;  %v4449_v28 = vpack.c.bf16 %v78_v19, %v74_v16  ;;  %v80_v29 = vld [vmem:[#allocation3 + $0x180] sm:$0xff]  ;;  %v462_v11 = vmul.f32 %v2957_v7, %v4379_v4 }
  0x24   :  { %3062 = vmatpush1.bf16.msra.mxu1 %v4425_v58  ;;  %3032 = vmatprep.subr.bf16.mxu0 %v4429_v61  ;;  %v87_v24 = vld [vmem:[#allocation3 + $0x1b8] sm:$0xff]  ;;  %v84_v30 = vld [vmem:[#allocation3 + $0x1a0] sm:$0xff]  ;;  %v4453_v32 = vpack.c.bf16 %v85_v21, %v81_v20  ;;  %v82_v34 = vld [vmem:[#allocation3 + $0x190] sm:$0xff] }
  0x25   :  { %3064 = vmatprep.subr.bf16.mxu1 %v4431_v62  ;;  %v4455_v33 = vpack.c.bf16 %v87_v24, %v83_v23  ;;  %v86_v37 = vld [vmem:[#allocation3 + $0x1b0] sm:$0xff]  ;;  %v89_v38 = vld [vmem:[#allocation3 + $0x1c8] sm:$0xff]  ;;  %v91_v40 = vld [vmem:[#allocation3 + $0x1d8] sm:$0xff]  ;;  %v4462_v46 = vpack.c.bf16 %v84_v30, %v80_v29  ;;  %v463_v13 = vsel %vm110_vm1, %v462_v11, 0.0 }
  0x26   :  { %v93_v39 = vld [vmem:[#allocation3 + $0x1e8] sm:$0xff]  ;;  %v95_v41 = vld [vmem:[#allocation3 + $0x1f8] sm:$0xff]  ;;  %v4464_v47 = vpack.c.bf16 %v86_v37, %v82_v34  ;;  %v88_v50 = vld [vmem:[#allocation3 + $0x1c0] sm:$0xff]  ;;  %464 = vadd.xlane.f32.xlu1 %v463_v13  ;;  %v2961_v13 = vsel %vm635_vm6, 1.0, %v4332_v1 }
  0x27   :  { %3034 = vmatpush1.bf16.msra.mxu0 %v4435_v9  ;;  %v4468_v51 = vpack.c.bf16 %v93_v39, %v89_v38  ;;  %v4470_v52 = vpack.c.bf16 %v95_v41, %v91_v40  ;;  %v92_v53 = vld [vmem:[#allocation3 + $0x1e0] sm:$0xff]  ;;  %v90_v54 = vld [vmem:[#allocation3 + $0x1d0] sm:$0xff] }
  0x28   :  { %3066 = vmatpush1.bf16.msra.mxu1 %v4437_v10  ;;  %3036 = vmatprep.subr.bf16.mxu0 %v4441_v14  ;;  %v94_v55 = vld [vmem:[#allocation3 + $0x1f0] sm:$0xff]  ;;  %v4475_v59 = vpack.c.bf16 %v92_v53, %v88_v50 }
  0x29   :  { %3068 = vmatprep.subr.bf16.mxu1 %v4443_v15  ;;  %v4477_v60 = vpack.c.bf16 %v94_v55, %v90_v54 }
  0x2b   :  { %3038 = vmatpush1.bf16.msra.mxu0 %v4447_v25 }
  0x2c   :  { %3070 = vmatpush1.bf16.msra.mxu1 %v4449_v28  ;;  %3040 = vmatprep.subr.bf16.mxu0 %v4453_v32 }
  0x2d   :  { %3072 = vmatprep.subr.bf16.mxu1 %v4455_v33 }
  0x2f   :  { %3042 = vmatpush1.bf16.msra.mxu0 %v4462_v46 }
  0x30   :  { %3074 = vmatpush1.bf16.msra.mxu1 %v4464_v47  ;;  %3044 = vmatprep.subr.bf16.mxu0 %v4468_v51 }
  0x31   :  { %3076 = vmatprep.subr.bf16.mxu1 %v4470_v52 }
  0x33   :  { %3046 = vmatpush1.bf16.msra.mxu0 %v4475_v59 }
  0x34   :  { %3078 = vmatpush1.bf16.msra.mxu1 %v4477_v60  ;;  %3080 = vmatprep.subr.bf16.mxu0 %v4382_v8 }
  0x35   :  { %3112 = vmatprep.subr.bf16.mxu1 %v4384_v12 }
  0xa8   :  { %v113_v3 = vpop.xlane.xlu0 %112 }
  0xa9   :  { %v114_v5 = vmul.f32 %v4488_v63, %v113_v3 }
  0xab   :  { %v115_v6 = vadd.f32 %v4491_v0, %v114_v5 }
  0xad   :  { %182 = vmatmul.mubr.f32.vlgmr.msra.gmra.mrb[0].mxu0 %v115_v6  ;;  %253 = vmatmul.mubr.f32.vlgmr.msra.gmra.mrb[0].mxu1 %v115_v6 }
  0xae   :  { %3082 = vmatpush1.bf16.msra.mxu0 %v4388_v17  ;;  %3114 = vmatpush1.bf16.msra.mxu1 %v4390_v18  ;;  %v289_v55 = vpop.xlane.xlu0 %288 }
  0xaf   :  { %3084 = vmatprep.subr.bf16.mxu0 %v4393_v22  ;;  %3116 = vmatprep.subr.bf16.mxu1 %v4397_v26  ;;  %v290_v56 = vmul.f32 %v4488_v63, %v289_v55 }
  0xb0   :  { %357 = vmatprep.mubr.f32.mxu0 %v4332_v1  ;;  %428 = vmatprep.mubr.f32.mxu1 %v4332_v1 }
  0xb1   :  { %v291_v5 = vadd.f32 %v4491_v0, %v290_v56 }
  0xb2   :  { %3086 = vmatpush1.bf16.msra.mxu0 %v4399_v27  ;;  %3118 = vmatpush1.bf16.msra.mxu1 %v4402_v31 }
  0xb3   :  { %3088 = vmatprep.subr.bf16.mxu0 %v4405_v35  ;;  %3120 = vmatprep.subr.bf16.mxu1 %v4407_v36 }
  0xb6   :  { %3090 = vmatpush1.bf16.msra.mxu0 %v4411_v43  ;;  %3122 = vmatpush1.bf16.msra.mxu1 %v4413_v44 }
  0xb7   :  { %3092 = vmatprep.subr.bf16.mxu0 %v4417_v48  ;;  %3124 = vmatprep.subr.bf16.mxu1 %v4419_v49 }
  0xba   :  { %3094 = vmatpush1.bf16.msra.mxu0 %v4423_v57  ;;  %3126 = vmatpush1.bf16.msra.mxu1 %v4425_v58 }
  0xbb   :  { %3096 = vmatprep.subr.bf16.mxu0 %v4429_v61  ;;  %3128 = vmatprep.subr.bf16.mxu1 %v4431_v62 }
  0xbe   :  { %3098 = vmatpush1.bf16.msra.mxu0 %v4435_v9  ;;  %3130 = vmatpush1.bf16.msra.mxu1 %v4437_v10 }
  0xbf   :  { %3100 = vmatprep.subr.bf16.mxu0 %v4441_v14  ;;  %3132 = vmatprep.subr.bf16.mxu1 %v4443_v15 }
  0xc2   :  { %3102 = vmatpush1.bf16.msra.mxu0 %v4447_v25  ;;  %3134 = vmatpush1.bf16.msra.mxu1 %v4449_v28 }
  0xc3   :  { %3104 = vmatprep.subr.bf16.mxu0 %v4453_v32  ;;  %3136 = vmatprep.subr.bf16.mxu1 %v4455_v33 }
  0xc6   :  { %3106 = vmatpush1.bf16.msra.mxu0 %v4462_v46  ;;  %3138 = vmatpush1.bf16.msra.mxu1 %v4464_v47 }
  0xc7   :  { %3108 = vmatprep.subr.bf16.mxu0 %v4468_v51  ;;  %3140 = vmatprep.subr.bf16.mxu1 %v4470_v52 }
  0xca   :  { %3110 = vmatpush1.bf16.msra.mxu0 %v4475_v59  ;;  %3142 = vmatpush1.bf16.msra.mxu1 %v4477_v60 }
  0xcb   :  { %3144 = vmatprep.subr.bf16.mxu0 %v4382_v8  ;;  %3176 = vmatprep.subr.bf16.mxu1 %v4384_v12 }
 0x180   :  { %v183_v16 = vpop.f32.mrb[0].mxu0  ;;  %v254_v19 = vpop.f32.mrb[0].mxu1 }
 0x181   :  { %v2950_v20 = vmul.f32 -1.442695, %v183_v16  ;;  %v185_v21 = vpop.f32.mrb[1].mxu0  ;;  %v256_v23 = vpop.f32.mrb[1].mxu1  ;;  %v2952_v29 = vmul.f32 -1.442695, %v254_v19  ;;  %v638_v16 = vmul.f32 %v2961_v13, %v4379_v4 }
 0x182   :  { %v2951_v24 = vmul.f32 -1.442695, %v185_v21 }
 0x183   :  { %4043 = vpow2.f32 %v2950_v20  ;;  %v639_v19 = vsel %vm110_vm1, %v638_v16, 0.0 }
 0x184   :  { %4045 = vpow2.f32 %v2951_v24  ;;  %640 = vadd.xlane.f32.xlu1 %v639_v19 }
 0x185   :  { %4047 = vtanh.f32 %v256_v23 }
 0x186   :  { %4049 = vpow2.f32 %v2952_v29 }
 0x18d   :  { %v4044_v30 = vpop.eup %4043 }
 0x18e   :  { %v268_v34 = vadd.f32 1.0, %v4044_v30  ;;  %v4046_v37 = vpop.eup %4045 }
 0x18f   :  { %v269_v38 = vadd.f32 1.0, %v4046_v37  ;;  %v4048_v39 = vpop.eup %4047 }
 0x190   :  { %4051 = vrcp.f32 %v268_v34  ;;  %v4050_v40 = vpop.eup %4049 }
 0x191   :  { %4053 = vrcp.f32 %v269_v38  ;;  %v270_v50 = vadd.f32 1.0, %v4050_v40 }
 0x193   :  { %4055 = vrcp.f32 %v270_v50 }
 0x19a   :  { %v4052_v41 = vpop.eup %4051 }
 0x19b   :  { %v279_v42 = vmul.f32 %v4052_v41, %v4048_v39  ;;  %v4054_v45 = vpop.eup %4053 }
 0x19c   :  { %v278_v53 = vmul.f32 0.0, %v4054_v45 }
 0x19d   :  { %v4056_v3 = vpop.eup %4055 }
 0x19e   :  { %v4533_v54 = vadd.f32 %v279_v42, %v278_v53 }
 0x1a0   :  { %4057 = vtanh.f32 %v4533_v54 }
 0x1aa   :  { %v4058_v6 = vpop.eup %4057 }
 0x1ab   :  { %v282_v7 = vmul.f32 %v4058_v6, %v4056_v3 }
 0x1ad   :  { %v292_v11 = vadd.f32 %v291_v5, %v282_v7  ;;  %v465_v5 = vpop.xlane.xlu1 %464 }
 0x1ae   :  { %v466_v6 = vmul.f32 %v4488_v63, %v465_v5 }
 0x1af   :  { %358 = vmatmul.mubr.f32.vlgmr.msra.gmra.mrb[2].mxu0 %v292_v11  ;;  %429 = vmatmul.mubr.f32.vlgmr.msra.gmra.mrb[2].mxu1 %v292_v11 }
 0x1b0   :  { %3146 = vmatpush1.bf16.msra.mxu0 %v4388_v17  ;;  %3178 = vmatpush1.bf16.msra.mxu1 %v4390_v18  ;;  %v467_v11 = vadd.f32 %v4491_v0, %v466_v6 }
 0x1b1   :  { %3148 = vmatprep.subr.bf16.mxu0 %v4393_v22  ;;  %3180 = vmatprep.subr.bf16.mxu1 %v4397_v26 }
 0x1b2   :  { %533 = vmatprep.mubr.f32.mxu0 %v4332_v1  ;;  %604 = vmatprep.mubr.f32.mxu1 %v4332_v1 }
 0x1b4   :  { %3150 = vmatpush1.bf16.msra.mxu0 %v4399_v27  ;;  %3182 = vmatpush1.bf16.msra.mxu1 %v4402_v31 }
 0x1b5   :  { %3152 = vmatprep.subr.bf16.mxu0 %v4405_v35  ;;  %3184 = vmatprep.subr.bf16.mxu1 %v4407_v36 }
 0x1b8   :  { %3154 = vmatpush1.bf16.msra.mxu0 %v4411_v43  ;;  %3186 = vmatpush1.bf16.msra.mxu1 %v4413_v44 }
 0x1b9   :  { %3156 = vmatprep.subr.bf16.mxu0 %v4417_v48  ;;  %3188 = vmatprep.subr.bf16.mxu1 %v4419_v49 }
 0x1bc   :  { %3158 = vmatpush1.bf16.msra.mxu0 %v4423_v57  ;;  %3190 = vmatpush1.bf16.msra.mxu1 %v4425_v58 }
 0x1bd   :  { %3160 = vmatprep.subr.bf16.mxu0 %v4429_v61  ;;  %3192 = vmatprep.subr.bf16.mxu1 %v4431_v62 }
 0x1c0   :  { %3162 = vmatpush1.bf16.msra.mxu0 %v4435_v9  ;;  %3194 = vmatpush1.bf16.msra.mxu1 %v4437_v10 }
 0x1c1   :  { %3164 = vmatprep.subr.bf16.mxu0 %v4441_v14  ;;  %3196 = vmatprep.subr.bf16.mxu1 %v4443_v15 }
 0x1c4   :  { %3166 = vmatpush1.bf16.msra.mxu0 %v4447_v25  ;;  %3198 = vmatpush1.bf16.msra.mxu1 %v4449_v28 }
 0x1c5   :  { %3168 = vmatprep.subr.bf16.mxu0 %v4453_v32  ;;  %3200 = vmatprep.subr.bf16.mxu1 %v4455_v33 }
 0x1c8   :  { %3170 = vmatpush1.bf16.msra.mxu0 %v4462_v46  ;;  %3202 = vmatpush1.bf16.msra.mxu1 %v4464_v47 }
 0x1c9   :  { %3172 = vmatprep.subr.bf16.mxu0 %v4468_v51  ;;  %3204 = vmatprep.subr.bf16.mxu1 %v4470_v52 }
 0x1cc   :  { %3174 = vmatpush1.bf16.msra.mxu0 %v4475_v59  ;;  %3206 = vmatpush1.bf16.msra.mxu1 %v4477_v60 }
 0x1cd   :  { %3208 = vmatprep.subr.bf16.mxu0 %v4382_v8  ;;  %3240 = vmatprep.subr.bf16.mxu1 %v4384_v12 }
 0x282   :  { %v359_v20 = vpop.f32.mrb[2].mxu0  ;;  %v430_v21 = vpop.f32.mrb[2].mxu1 }
 0x283   :  { %v2954_v23 = vmul.f32 -1.442695, %v359_v20  ;;  %v361_v24 = vpop.f32.mrb[3].mxu0  ;;  %v432_v29 = vpop.f32.mrb[3].mxu1  ;;  %v2956_v34 = vmul.f32 -1.442695, %v430_v21 }
 0x284   :  { %v2955_v30 = vmul.f32 -1.442695, %v361_v24 }
 0x285   :  { %4059 = vpow2.f32 %v2954_v23 }
 0x286   :  { %4061 = vpow2.f32 %v2955_v30 }
 0x287   :  { %4063 = vtanh.f32 %v432_v29 }
 0x288   :  { %4065 = vpow2.f32 %v2956_v34 }
 0x28f   :  { %v4060_v37 = vpop.eup %4059 }
 0x290   :  { %v444_v38 = vadd.f32 1.0, %v4060_v37  ;;  %v4062_v39 = vpop.eup %4061 }
 0x291   :  { %v445_v40 = vadd.f32 1.0, %v4062_v39  ;;  %v4064_v41 = vpop.eup %4063 }
 0x292   :  { %4067 = vrcp.f32 %v444_v38  ;;  %v4066_v42 = vpop.eup %4065 }
 0x293   :  { %4069 = vrcp.f32 %v445_v40  ;;  %v446_v55 = vadd.f32 1.0, %v4066_v42 }
 0x295   :  { %4071 = vrcp.f32 %v446_v55 }
 0x29c   :  { %v4068_v45 = vpop.eup %4067 }
 0x29d   :  { %v455_v50 = vmul.f32 %v4068_v45, %v4064_v41  ;;  %v4070_v53 = vpop.eup %4069 }
 0x29e   :  { %v454_v56 = vmul.f32 %v4070_v53, %v4533_v54  ;;  %v2965_v54 = vsel %vm811_vm7, 1.0, %v4332_v1 }
 0x29f   :  { %v4072_v7 = vpop.eup %4071  ;;  %v814_v20 = vmul.f32 %v2965_v54, %v4379_v4 }
 0x2a0   :  { %v4577_v3 = vadd.f32 %v455_v50, %v454_v56 }
 0x2a1   :  { %v815_v21 = vsel %vm110_vm1, %v814_v20, 0.0 }
 0x2a2   :  { %4073 = vtanh.f32 %v4577_v3  ;;  %816 = vadd.xlane.f32.xlu0 %v815_v21 }
 0x2ac   :  { %v4074_v13 = vpop.eup %4073 }
 0x2ad   :  { %v458_v16 = vmul.f32 %v4074_v13, %v4072_v7 }
 0x2af   :  { %v468_v19 = vadd.f32 %v467_v11, %v458_v16  ;;  %v641_v11 = vpop.xlane.xlu1 %640 }
 0x2b0   :  { %v642_v13 = vmul.f32 %v4488_v63, %v641_v11 }
 0x2b1   :  { %534 = vmatmul.mubr.f32.vlgmr.msra.gmra.mrb[4].mxu0 %v468_v19  ;;  %605 = vmatmul.mubr.f32.vlgmr.msra.gmra.mrb[4].mxu1 %v468_v19 }
 0x2b2   :  { %3210 = vmatpush1.bf16.msra.mxu0 %v4388_v17  ;;  %3242 = vmatpush1.bf16.msra.mxu1 %v4390_v18  ;;  %v643_v19 = vadd.f32 %v4491_v0, %v642_v13 }
 0x2b3   :  { %3212 = vmatprep.subr.bf16.mxu0 %v4393_v22  ;;  %3244 = vmatprep.subr.bf16.mxu1 %v4397_v26 }
 0x2b4   :  { %709 = vmatprep.mubr.f32.mxu0 %v4332_v1  ;;  %780 = vmatprep.mubr.f32.mxu1 %v4332_v1 }
 0x2b6   :  { %3214 = vmatpush1.bf16.msra.mxu0 %v4399_v27  ;;  %3246 = vmatpush1.bf16.msra.mxu1 %v4402_v31 }
 0x2b7   :  { %3216 = vmatprep.subr.bf16.mxu0 %v4405_v35  ;;  %3248 = vmatprep.subr.bf16.mxu1 %v4407_v36 }
 0x2ba   :  { %3218 = vmatpush1.bf16.msra.mxu0 %v4411_v43  ;;  %3250 = vmatpush1.bf16.msra.mxu1 %v4413_v44 }
 0x2bb   :  { %3220 = vmatprep.subr.bf16.mxu0 %v4417_v48  ;;  %3252 = vmatprep.subr.bf16.mxu1 %v4419_v49 }
 0x2be   :  { %3222 = vmatpush1.bf16.msra.mxu0 %v4423_v57  ;;  %3254 = vmatpush1.bf16.msra.mxu1 %v4425_v58 }
 0x2bf   :  { %3224 = vmatprep.subr.bf16.mxu0 %v4429_v61  ;;  %3256 = vmatprep.subr.bf16.mxu1 %v4431_v62 }
 0x2c2   :  { %3226 = vmatpush1.bf16.msra.mxu0 %v4435_v9  ;;  %3258 = vmatpush1.bf16.msra.mxu1 %v4437_v10 }
 0x2c3   :  { %3228 = vmatprep.subr.bf16.mxu0 %v4441_v14  ;;  %3260 = vmatprep.subr.bf16.mxu1 %v4443_v15 }
 0x2c6   :  { %3230 = vmatpush1.bf16.msra.mxu0 %v4447_v25  ;;  %3262 = vmatpush1.bf16.msra.mxu1 %v4449_v28 }
 0x2c7   :  { %3232 = vmatprep.subr.bf16.mxu0 %v4453_v32  ;;  %3264 = vmatprep.subr.bf16.mxu1 %v4455_v33 }
 0x2ca   :  { %3234 = vmatpush1.bf16.msra.mxu0 %v4462_v46  ;;  %3266 = vmatpush1.bf16.msra.mxu1 %v4464_v47 }
 0x2cb   :  { %3236 = vmatprep.subr.bf16.mxu0 %v4468_v51  ;;  %3268 = vmatprep.subr.bf16.mxu1 %v4470_v52 }
 0x2ce   :  { %3238 = vmatpush1.bf16.msra.mxu0 %v4475_v59  ;;  %3270 = vmatpush1.bf16.msra.mxu1 %v4477_v60 }
 0x2cf   :  { %3272 = vmatprep.subr.bf16.mxu0 %v4382_v8  ;;  %3304 = vmatprep.subr.bf16.mxu1 %v4384_v12 }
 0x384   :  { %v535_v23 = vpop.f32.mrb[4].mxu0  ;;  %v606_v24 = vpop.f32.mrb[4].mxu1 }
 0x385   :  { %v2958_v29 = vmul.f32 -1.442695, %v535_v23  ;;  %v537_v30 = vpop.f32.mrb[5].mxu0  ;;  %v608_v34 = vpop.f32.mrb[5].mxu1  ;;  %v2960_v38 = vmul.f32 -1.442695, %v606_v24 }
 0x386   :  { %v2959_v37 = vmul.f32 -1.442695, %v537_v30 }
 0x387   :  { %4075 = vpow2.f32 %v2958_v29 }
 0x388   :  { %4077 = vpow2.f32 %v2959_v37 }
 0x389   :  { %4079 = vtanh.f32 %v608_v34 }
 0x38a   :  { %4081 = vpow2.f32 %v2960_v38 }
 0x391   :  { %v4076_v39 = vpop.eup %4075 }
 0x392   :  { %v620_v40 = vadd.f32 1.0, %v4076_v39  ;;  %v4078_v41 = vpop.eup %4077 }
 0x393   :  { %v621_v42 = vadd.f32 1.0, %v4078_v41  ;;  %v4080_v45 = vpop.eup %4079 }
 0x394   :  { %4083 = vrcp.f32 %v620_v40  ;;  %v4082_v50 = vpop.eup %4081 }
 0x395   :  { %4085 = vrcp.f32 %v621_v42  ;;  %v622_v5 = vadd.f32 1.0, %v4082_v50 }
 0x397   :  { %4087 = vrcp.f32 %v622_v5 }
 0x39e   :  { %v4084_v53 = vpop.eup %4083 }
 0x39f   :  { %v631_v55 = vmul.f32 %v4084_v53, %v4080_v45  ;;  %v4086_v56 = vpop.eup %4085 }
 0x3a0   :  { %v630_v6 = vmul.f32 %v4086_v56, %v4577_v3  ;;  %v2969_v3 = vsel %vm987_vm8, 1.0, %v4332_v1 }
 0x3a1   :  { %v4088_v16 = vpop.eup %4087  ;;  %v990_v23 = vmul.f32 %v2969_v3, %v4379_v4 }
 0x3a2   :  { %v4621_v7 = vadd.f32 %v631_v55, %v630_v6 }
 0x3a3   :  { %v991_v24 = vsel %vm110_vm1, %v990_v23, 0.0 }
 0x3a4   :  { %4089 = vtanh.f32 %v4621_v7  ;;  %992 = vadd.xlane.f32.xlu1 %v991_v24 }
 0x3ae   :  { %v4090_v54 = vpop.eup %4089 }
 0x3af   :  { %v634_v20 = vmul.f32 %v4090_v54, %v4088_v16 }
 0x3b1   :  { %v644_v21 = vadd.f32 %v643_v19, %v634_v20  ;;  %v817_v19 = vpop.xlane.xlu0 %816 }
 0x3b2   :  { %v818_v54 = vmul.f32 %v4488_v63, %v817_v19 }
 0x3b3   :  { %710 = vmatmul.mubr.f32.vlgmr.msra.gmra.mrb[6].mxu0 %v644_v21  ;;  %781 = vmatmul.mubr.f32.vlgmr.msra.gmra.mrb[6].mxu1 %v644_v21 }
 0x3b4   :  { %3274 = vmatpush1.bf16.msra.mxu0 %v4388_v17  ;;  %3306 = vmatpush1.bf16.msra.mxu1 %v4390_v18  ;;  %v819_v21 = vadd.f32 %v4491_v0, %v818_v54 }
 0x3b5   :  { %3276 = vmatprep.subr.bf16.mxu0 %v4393_v22  ;;  %3308 = vmatprep.subr.bf16.mxu1 %v4397_v26 }
 0x3b6   :  { %885 = vmatprep.mubr.f32.mxu0 %v4332_v1  ;;  %956 = vmatprep.mubr.f32.mxu1 %v4332_v1 }
 0x3b8   :  { %3278 = vmatpush1.bf16.msra.mxu0 %v4399_v27  ;;  %3310 = vmatpush1.bf16.msra.mxu1 %v4402_v31 }
 0x3b9   :  { %3280 = vmatprep.subr.bf16.mxu0 %v4405_v35  ;;  %3312 = vmatprep.subr.bf16.mxu1 %v4407_v36 }
 0x3bc   :  { %3282 = vmatpush1.bf16.msra.mxu0 %v4411_v43  ;;  %3314 = vmatpush1.bf16.msra.mxu1 %v4413_v44 }
 0x3bd   :  { %3284 = vmatprep.subr.bf16.mxu0 %v4417_v48  ;;  %3316 = vmatprep.subr.bf16.mxu1 %v4419_v49 }
 0x3c0   :  { %3286 = vmatpush1.bf16.msra.mxu0 %v4423_v57  ;;  %3318 = vmatpush1.bf16.msra.mxu1 %v4425_v58 }
 0x3c1   :  { %3288 = vmatprep.subr.bf16.mxu0 %v4429_v61  ;;  %3320 = vmatprep.subr.bf16.mxu1 %v4431_v62 }
 0x3c4   :  { %3290 = vmatpush1.bf16.msra.mxu0 %v4435_v9  ;;  %3322 = vmatpush1.bf16.msra.mxu1 %v4437_v10 }
 0x3c5   :  { %3292 = vmatprep.subr.bf16.mxu0 %v4441_v14  ;;  %3324 = vmatprep.subr.bf16.mxu1 %v4443_v15 }
 0x3c8   :  { %3294 = vmatpush1.bf16.msra.mxu0 %v4447_v25  ;;  %3326 = vmatpush1.bf16.msra.mxu1 %v4449_v28 }
 0x3c9   :  { %3296 = vmatprep.subr.bf16.mxu0 %v4453_v32  ;;  %3328 = vmatprep.subr.bf16.mxu1 %v4455_v33 }
 0x3cc   :  { %3298 = vmatpush1.bf16.msra.mxu0 %v4462_v46  ;;  %3330 = vmatpush1.bf16.msra.mxu1 %v4464_v47 }
 0x3cd   :  { %3300 = vmatprep.subr.bf16.mxu0 %v4468_v51  ;;  %3332 = vmatprep.subr.bf16.mxu1 %v4470_v52 }
 0x3d0   :  { %3302 = vmatpush1.bf16.msra.mxu0 %v4475_v59  ;;  %3334 = vmatpush1.bf16.msra.mxu1 %v4477_v60 }
 0x3d1   :  { %3336 = vmatprep.subr.bf16.mxu0 %v4382_v8  ;;  %3368 = vmatprep.subr.bf16.mxu1 %v4384_v12 }
 0x486   :  { %v711_v29 = vpop.f32.mrb[6].mxu0  ;;  %v782_v30 = vpop.f32.mrb[6].mxu1 }
 0x487   :  { %v2962_v34 = vmul.f32 -1.442695, %v711_v29  ;;  %v713_v37 = vpop.f32.mrb[7].mxu0  ;;  %v784_v38 = vpop.f32.mrb[7].mxu1  ;;  %v2964_v40 = vmul.f32 -1.442695, %v782_v30 }
 0x488   :  { %v2963_v39 = vmul.f32 -1.442695, %v713_v37 }
 0x489   :  { %4091 = vpow2.f32 %v2962_v34 }
 0x48a   :  { %4093 = vpow2.f32 %v2963_v39 }
 0x48b   :  { %4095 = vtanh.f32 %v784_v38 }
 0x48c   :  { %4097 = vpow2.f32 %v2964_v40 }
 0x493   :  { %v4092_v41 = vpop.eup %4091 }
 0x494   :  { %v796_v42 = vadd.f32 1.0, %v4092_v41  ;;  %v4094_v45 = vpop.eup %4093 }
 0x495   :  { %v797_v50 = vadd.f32 1.0, %v4094_v45  ;;  %v4096_v53 = vpop.eup %4095 }
 0x496   :  { %4099 = vrcp.f32 %v796_v42  ;;  %v4098_v55 = vpop.eup %4097 }
 0x497   :  { %4101 = vrcp.f32 %v797_v50  ;;  %v798_v11 = vadd.f32 1.0, %v4098_v55 }
 0x499   :  { %4103 = vrcp.f32 %v798_v11 }
 0x4a0   :  { %v4100_v56 = vpop.eup %4099 }
 0x4a1   :  { %v807_v5 = vmul.f32 %v4100_v56, %v4096_v53  ;;  %v4102_v6 = vpop.eup %4101 }
 0x4a2   :  { %v806_v13 = vmul.f32 %v4102_v6, %v4621_v7  ;;  %v2973_v7 = vsel %vm1163_vm9, 1.0, %v4332_v1 }
 0x4a3   :  { %v4104_v20 = vpop.eup %4103  ;;  %v1166_v29 = vmul.f32 %v2973_v7, %v4379_v4 }
 0x4a4   :  { %v4665_v16 = vadd.f32 %v807_v5, %v806_v13 }
 0x4a5   :  { %v1167_v30 = vsel %vm110_vm1, %v1166_v29, 0.0 }
 0x4a6   :  { %4105 = vtanh.f32 %v4665_v16  ;;  %1168 = vadd.xlane.f32.xlu0 %v1167_v30  ;;  %v4753_v30 = vld [vmem:[%s5164_s0] sm:$0xff] }
 0x4b0   :  { %v4106_v3 = vpop.eup %4105 }
 0x4b1   :  { %v810_v23 = vmul.f32 %v4106_v3, %v4104_v20  ;;  %v993_v20 = vpop.xlane.xlu1 %992 }
 0x4b3   :  { %v820_v24 = vadd.f32 %v819_v21, %v810_v23  ;;  %v994_v21 = vmul.f32 %v4488_v63, %v993_v20 }
 0x4b5   :  { %886 = vmatmul.mubr.f32.vlgmr.msra.gmra.mrb[8].mxu0 %v820_v24  ;;  %957 = vmatmul.mubr.f32.vlgmr.msra.gmra.mrb[8].mxu1 %v820_v24  ;;  %v995_v23 = vadd.f32 %v4491_v0, %v994_v21 }
 0x4b6   :  { %3338 = vmatpush1.bf16.msra.mxu0 %v4388_v17  ;;  %3370 = vmatpush1.bf16.msra.mxu1 %v4390_v18 }
 0x4b7   :  { %3340 = vmatprep.subr.bf16.mxu0 %v4393_v22  ;;  %3372 = vmatprep.subr.bf16.mxu1 %v4397_v26 }
 0x4b8   :  { %1061 = vmatprep.mubr.f32.mxu0 %v4332_v1  ;;  %1132 = vmatprep.mubr.f32.mxu1 %v4332_v1 }
 0x4ba   :  { %3342 = vmatpush1.bf16.msra.mxu0 %v4399_v27  ;;  %3374 = vmatpush1.bf16.msra.mxu1 %v4402_v31 }
 0x4bb   :  { %3344 = vmatprep.subr.bf16.mxu0 %v4405_v35  ;;  %3376 = vmatprep.subr.bf16.mxu1 %v4407_v36 }
 0x4be   :  { %3346 = vmatpush1.bf16.msra.mxu0 %v4411_v43  ;;  %3378 = vmatpush1.bf16.msra.mxu1 %v4413_v44 }
 0x4bf   :  { %3348 = vmatprep.subr.bf16.mxu0 %v4417_v48  ;;  %3380 = vmatprep.subr.bf16.mxu1 %v4419_v49 }
 0x4c2   :  { %3350 = vmatpush1.bf16.msra.mxu0 %v4423_v57  ;;  %3382 = vmatpush1.bf16.msra.mxu1 %v4425_v58 }
 0x4c3   :  { %3352 = vmatprep.subr.bf16.mxu0 %v4429_v61  ;;  %3384 = vmatprep.subr.bf16.mxu1 %v4431_v62 }
 0x4c6   :  { %3354 = vmatpush1.bf16.msra.mxu0 %v4435_v9  ;;  %3386 = vmatpush1.bf16.msra.mxu1 %v4437_v10 }
 0x4c7   :  { %3356 = vmatprep.subr.bf16.mxu0 %v4441_v14  ;;  %3388 = vmatprep.subr.bf16.mxu1 %v4443_v15 }
 0x4ca   :  { %3358 = vmatpush1.bf16.msra.mxu0 %v4447_v25  ;;  %3390 = vmatpush1.bf16.msra.mxu1 %v4449_v28 }
 0x4cb   :  { %3360 = vmatprep.subr.bf16.mxu0 %v4453_v32  ;;  %3392 = vmatprep.subr.bf16.mxu1 %v4455_v33 }
 0x4ce   :  { %3362 = vmatpush1.bf16.msra.mxu0 %v4462_v46  ;;  %3394 = vmatpush1.bf16.msra.mxu1 %v4464_v47 }
 0x4cf   :  { %3364 = vmatprep.subr.bf16.mxu0 %v4468_v51  ;;  %3396 = vmatprep.subr.bf16.mxu1 %v4470_v52 }
 0x4d2   :  { %3366 = vmatpush1.bf16.msra.mxu0 %v4475_v59  ;;  %3398 = vmatpush1.bf16.msra.mxu1 %v4477_v60 }
 0x4d3   :  { %3400 = vmatprep.subr.bf16.mxu0 %v4382_v8  ;;  %3432 = vmatprep.subr.bf16.mxu1 %v4384_v12 }
 0x588   :  { %v887_v34 = vpop.f32.mrb[8].mxu0  ;;  %v958_v37 = vpop.f32.mrb[8].mxu1 }
 0x589   :  { %v2966_v38 = vmul.f32 -1.442695, %v887_v34  ;;  %v889_v39 = vpop.f32.mrb[9].mxu0  ;;  %v960_v40 = vpop.f32.mrb[9].mxu1  ;;  %v2968_v42 = vmul.f32 -1.442695, %v958_v37 }
 0x58a   :  { %v2967_v41 = vmul.f32 -1.442695, %v889_v39 }
 0x58b   :  { %4107 = vpow2.f32 %v2966_v38 }
 0x58c   :  { %4109 = vpow2.f32 %v2967_v41 }
 0x58d   :  { %4111 = vtanh.f32 %v960_v40 }
 0x58e   :  { %4113 = vpow2.f32 %v2968_v42 }
 0x595   :  { %v4108_v45 = vpop.eup %4107 }
 0x596   :  { %v972_v50 = vadd.f32 1.0, %v4108_v45  ;;  %v4110_v53 = vpop.eup %4109 }
 0x597   :  { %v973_v55 = vadd.f32 1.0, %v4110_v53  ;;  %v4112_v4 = vpop.eup %4111 }
 0x598   :  { %4115 = vrcp.f32 %v972_v50  ;;  %v4114_v56 = vpop.eup %4113 }
 0x599   :  { %4117 = vrcp.f32 %v973_v55  ;;  %v974_v13 = vadd.f32 1.0, %v4114_v56 }
 0x59b   :  { %4119 = vrcp.f32 %v974_v13 }
 0x5a2   :  { %v4116_v5 = vpop.eup %4115 }
 0x5a3   :  { %v983_v6 = vmul.f32 %v4116_v5, %v4112_v4  ;;  %v4118_v11 = vpop.eup %4117 }
 0x5a4   :  { %v982_v19 = vmul.f32 %v4118_v11, %v4665_v16  ;;  %v2977_v16 = vsel %vm1339_vm10, 1.0, %v4332_v1 }
 0x5a5   :  { %v4120_v3 = vpop.eup %4119  ;;  %v1342_v34 = vmul.f32 %v4753_v30, %v2977_v16 }
 0x5a6   :  { %v4709_v54 = vadd.f32 %v983_v6, %v982_v19 }
 0x5a7   :  { %v1343_v37 = vsel %vm110_vm1, %v1342_v34, 0.0 }
 0x5a8   :  { %4121 = vtanh.f32 %v4709_v54  ;;  %1344 = vadd.xlane.f32.xlu1 %v1343_v37 }
 0x5b2   :  { %v4122_v24 = vpop.eup %4121 }
 0x5b3   :  { %v986_v7 = vmul.f32 %v4122_v24, %v4120_v3 }
 0x5b5   :  { %v996_v29 = vadd.f32 %v995_v23, %v986_v7  ;;  %v1169_v23 = vpop.xlane.xlu0 %1168 }
 0x5b6   :  { %v1170_v24 = vmul.f32 %v4488_v63, %v1169_v23 }
 0x5b7   :  { %1062 = vmatmul.mubr.f32.vlgmr.msra.gmra.mrb[10].mxu0 %v996_v29  ;;  %1133 = vmatmul.mubr.f32.vlgmr.msra.gmra.mrb[10].mxu1 %v996_v29 }
 0x5b8   :  { %3402 = vmatpush1.bf16.msra.mxu0 %v4388_v17  ;;  %3434 = vmatpush1.bf16.msra.mxu1 %v4390_v18  ;;  %v1171_v29 = vadd.f32 %v4491_v0, %v1170_v24 }
 0x5b9   :  { %3404 = vmatprep.subr.bf16.mxu0 %v4393_v22  ;;  %3436 = vmatprep.subr.bf16.mxu1 %v4397_v26 }
 0x5ba   :  { %1237 = vmatprep.mubr.f32.mxu0 %v4332_v1  ;;  %1308 = vmatprep.mubr.f32.mxu1 %v4332_v1 }
 0x5bc   :  { %3406 = vmatpush1.bf16.msra.mxu0 %v4399_v27  ;;  %3438 = vmatpush1.bf16.msra.mxu1 %v4402_v31 }
 0x5bd   :  { %3408 = vmatprep.subr.bf16.mxu0 %v4405_v35  ;;  %3440 = vmatprep.subr.bf16.mxu1 %v4407_v36 }
 0x5c0   :  { %3410 = vmatpush1.bf16.msra.mxu0 %v4411_v43  ;;  %3442 = vmatpush1.bf16.msra.mxu1 %v4413_v44 }
 0x5c1   :  { %3412 = vmatprep.subr.bf16.mxu0 %v4417_v48  ;;  %3444 = vmatprep.subr.bf16.mxu1 %v4419_v49 }
 0x5c4   :  { %3414 = vmatpush1.bf16.msra.mxu0 %v4423_v57  ;;  %3446 = vmatpush1.bf16.msra.mxu1 %v4425_v58 }
 0x5c5   :  { %3416 = vmatprep.subr.bf16.mxu0 %v4429_v61  ;;  %3448 = vmatprep.subr.bf16.mxu1 %v4431_v62 }
 0x5c8   :  { %3418 = vmatpush1.bf16.msra.mxu0 %v4435_v9  ;;  %3450 = vmatpush1.bf16.msra.mxu1 %v4437_v10 }
 0x5c9   :  { %3420 = vmatprep.subr.bf16.mxu0 %v4441_v14  ;;  %3452 = vmatprep.subr.bf16.mxu1 %v4443_v15 }
 0x5cc   :  { %3422 = vmatpush1.bf16.msra.mxu0 %v4447_v25  ;;  %3454 = vmatpush1.bf16.msra.mxu1 %v4449_v28 }
 0x5cd   :  { %3424 = vmatprep.subr.bf16.mxu0 %v4453_v32  ;;  %3456 = vmatprep.subr.bf16.mxu1 %v4455_v33 }
 0x5d0   :  { %3426 = vmatpush1.bf16.msra.mxu0 %v4462_v46  ;;  %3458 = vmatpush1.bf16.msra.mxu1 %v4464_v47 }
 0x5d1   :  { %3428 = vmatprep.subr.bf16.mxu0 %v4468_v51  ;;  %3460 = vmatprep.subr.bf16.mxu1 %v4470_v52 }
 0x5d4   :  { %3430 = vmatpush1.bf16.msra.mxu0 %v4475_v59  ;;  %3462 = vmatpush1.bf16.msra.mxu1 %v4477_v60 }
 0x5d5   :  { %3464 = vmatprep.subr.bf16.mxu0 %v4382_v8  ;;  %3496 = vmatprep.subr.bf16.mxu1 %v4384_v12 }
 0x68a   :  { %v1063_v38 = vpop.f32.mrb[10].mxu0  ;;  %v1134_v39 = vpop.f32.mrb[10].mxu1 }
 0x68b   :  { %v2970_v40 = vmul.f32 -1.442695, %v1063_v38  ;;  %v1065_v41 = vpop.f32.mrb[11].mxu0  ;;  %v1136_v42 = vpop.f32.mrb[11].mxu1  ;;  %v2972_v50 = vmul.f32 -1.442695, %v1134_v39 }
 0x68c   :  { %v2971_v45 = vmul.f32 -1.442695, %v1065_v41 }
 0x68d   :  { %4123 = vpow2.f32 %v2970_v40 }
 0x68e   :  { %4125 = vpow2.f32 %v2971_v45 }
 0x68f   :  { %4127 = vtanh.f32 %v1136_v42 }
 0x690   :  { %4129 = vpow2.f32 %v2972_v50 }
 0x697   :  { %v4124_v53 = vpop.eup %4123 }
 0x698   :  { %v1148_v55 = vadd.f32 1.0, %v4124_v53  ;;  %v4126_v4 = vpop.eup %4125 }
 0x699   :  { %v1149_v56 = vadd.f32 1.0, %v4126_v4  ;;  %v4128_v5 = vpop.eup %4127 }
 0x69a   :  { %4131 = vrcp.f32 %v1148_v55  ;;  %v4130_v6 = vpop.eup %4129 }
 0x69b   :  { %4133 = vrcp.f32 %v1149_v56  ;;  %v1150_v20 = vadd.f32 1.0, %v4130_v6 }
 0x69d   :  { %4135 = vrcp.f32 %v1150_v20 }
 0x6a4   :  { %v4132_v11 = vpop.eup %4131 }
 0x6a5   :  { %v1159_v13 = vmul.f32 %v4132_v11, %v4128_v5  ;;  %v4134_v19 = vpop.eup %4133 }
 0x6a6   :  { %v1158_v21 = vmul.f32 %v4134_v19, %v4709_v54  ;;  %v2981_v54 = vsel %vm1515_vm11, 1.0, %v4332_v1 }
 0x6a7   :  { %v4136_v7 = vpop.eup %4135  ;;  %v1518_v38 = vmul.f32 %v4753_v30, %v2981_v54 }
 0x6a8   :  { %v4758_v3 = vadd.f32 %v1159_v13, %v1158_v21 }
 0x6a9   :  { %v1519_v39 = vsel %vm110_vm1, %v1518_v38, 0.0 }
 0x6aa   :  { %4137 = vtanh.f32 %v4758_v3  ;;  %1520 = vadd.xlane.f32.xlu0 %v1519_v39 }
 0x6b4   :  { %v4138_v16 = vpop.eup %4137 }
 0x6b5   :  { %v1162_v34 = vmul.f32 %v4138_v16, %v4136_v7 }
 0x6b7   :  { %v1172_v37 = vadd.f32 %v1171_v29, %v1162_v34  ;;  %v1345_v29 = vpop.xlane.xlu1 %1344 }
 0x6b8   :  { %v1346_v16 = vmul.f32 %v4488_v63, %v1345_v29 }
 0x6b9   :  { %1238 = vmatmul.mubr.f32.vlgmr.msra.gmra.mrb[12].mxu0 %v1172_v37  ;;  %1309 = vmatmul.mubr.f32.vlgmr.msra.gmra.mrb[12].mxu1 %v1172_v37 }
 0x6ba   :  { %3466 = vmatpush1.bf16.msra.mxu0 %v4388_v17  ;;  %3498 = vmatpush1.bf16.msra.mxu1 %v4390_v18  ;;  %v1347_v37 = vadd.f32 %v4491_v0, %v1346_v16 }
 0x6bb   :  { %3468 = vmatprep.subr.bf16.mxu0 %v4393_v22  ;;  %3500 = vmatprep.subr.bf16.mxu1 %v4397_v26 }
 0x6bc   :  { %1413 = vmatprep.mubr.f32.mxu0 %v4332_v1  ;;  %1484 = vmatprep.mubr.f32.mxu1 %v4332_v1 }
 0x6be   :  { %3470 = vmatpush1.bf16.msra.mxu0 %v4399_v27  ;;  %3502 = vmatpush1.bf16.msra.mxu1 %v4402_v31 }
 0x6bf   :  { %3472 = vmatprep.subr.bf16.mxu0 %v4405_v35  ;;  %3504 = vmatprep.subr.bf16.mxu1 %v4407_v36 }
 0x6c2   :  { %3474 = vmatpush1.bf16.msra.mxu0 %v4411_v43  ;;  %3506 = vmatpush1.bf16.msra.mxu1 %v4413_v44 }
 0x6c3   :  { %3476 = vmatprep.subr.bf16.mxu0 %v4417_v48  ;;  %3508 = vmatprep.subr.bf16.mxu1 %v4419_v49 }
 0x6c6   :  { %3478 = vmatpush1.bf16.msra.mxu0 %v4423_v57  ;;  %3510 = vmatpush1.bf16.msra.mxu1 %v4425_v58 }
 0x6c7   :  { %3480 = vmatprep.subr.bf16.mxu0 %v4429_v61  ;;  %3512 = vmatprep.subr.bf16.mxu1 %v4431_v62 }
 0x6ca   :  { %3482 = vmatpush1.bf16.msra.mxu0 %v4435_v9  ;;  %3514 = vmatpush1.bf16.msra.mxu1 %v4437_v10 }
 0x6cb   :  { %3484 = vmatprep.subr.bf16.mxu0 %v4441_v14  ;;  %3516 = vmatprep.subr.bf16.mxu1 %v4443_v15 }
 0x6ce   :  { %3486 = vmatpush1.bf16.msra.mxu0 %v4447_v25  ;;  %3518 = vmatpush1.bf16.msra.mxu1 %v4449_v28 }
 0x6cf   :  { %3488 = vmatprep.subr.bf16.mxu0 %v4453_v32  ;;  %3520 = vmatprep.subr.bf16.mxu1 %v4455_v33 }
 0x6d2   :  { %3490 = vmatpush1.bf16.msra.mxu0 %v4462_v46  ;;  %3522 = vmatpush1.bf16.msra.mxu1 %v4464_v47 }
 0x6d3   :  { %3492 = vmatprep.subr.bf16.mxu0 %v4468_v51  ;;  %3524 = vmatprep.subr.bf16.mxu1 %v4470_v52 }
 0x6d6   :  { %3494 = vmatpush1.bf16.msra.mxu0 %v4475_v59  ;;  %3526 = vmatpush1.bf16.msra.mxu1 %v4477_v60 }
 0x6d7   :  { %3528 = vmatprep.subr.bf16.mxu0 %v4382_v8  ;;  %3560 = vmatprep.subr.bf16.mxu1 %v4384_v12 }
 0x78c   :  { %v1239_v40 = vpop.f32.mrb[12].mxu0  ;;  %v1310_v41 = vpop.f32.mrb[12].mxu1 }
 0x78d   :  { %v2974_v42 = vmul.f32 -1.442695, %v1239_v40  ;;  %v1241_v45 = vpop.f32.mrb[13].mxu0  ;;  %v1312_v50 = vpop.f32.mrb[13].mxu1  ;;  %v2976_v55 = vmul.f32 -1.442695, %v1310_v41 }
 0x78e   :  { %v2975_v53 = vmul.f32 -1.442695, %v1241_v45 }
 0x78f   :  { %4139 = vpow2.f32 %v2974_v42 }
 0x790   :  { %4141 = vpow2.f32 %v2975_v53 }
 0x791   :  { %4143 = vtanh.f32 %v1312_v50 }
 0x792   :  { %4145 = vpow2.f32 %v2976_v55 }
 0x799   :  { %v4140_v4 = vpop.eup %4139 }
 0x79a   :  { %v1324_v56 = vadd.f32 1.0, %v4140_v4  ;;  %v4142_v5 = vpop.eup %4141 }
 0x79b   :  { %v1325_v6 = vadd.f32 1.0, %v4142_v5  ;;  %v4144_v11 = vpop.eup %4143 }
 0x79c   :  { %4147 = vrcp.f32 %v1324_v56  ;;  %v4146_v13 = vpop.eup %4145 }
 0x79d   :  { %4149 = vrcp.f32 %v1325_v6  ;;  %v1326_v23 = vadd.f32 1.0, %v4146_v13 }
 0x79f   :  { %4151 = vrcp.f32 %v1326_v23 }
 0x7a6   :  { %v4148_v19 = vpop.eup %4147 }
 0x7a7   :  { %v1335_v20 = vmul.f32 %v4148_v19, %v4144_v11  ;;  %v4150_v21 = vpop.eup %4149 }
 0x7a8   :  { %v1334_v24 = vmul.f32 %v4150_v21, %v4758_v3  ;;  %v2985_v3 = vsel %vm1691_vm12, 1.0, %v4332_v1 }
 0x7a9   :  { %v4152_v34 = vpop.eup %4151  ;;  %v1694_v40 = vmul.f32 %v4753_v30, %v2985_v3 }
 0x7aa   :  { %v4802_v7 = vadd.f32 %v1335_v20, %v1334_v24 }
 0x7ab   :  { %v1695_v41 = vsel %vm110_vm1, %v1694_v40, 0.0 }
 0x7ac   :  { %4153 = vtanh.f32 %v4802_v7  ;;  %1696 = vadd.xlane.f32.xlu1 %v1695_v41 }
 0x7b6   :  { %v4154_v54 = vpop.eup %4153 }
 0x7b7   :  { %v1338_v38 = vmul.f32 %v4154_v54, %v4152_v34 }
 0x7b9   :  { %v1348_v39 = vadd.f32 %v1347_v37, %v1338_v38  ;;  %v1521_v37 = vpop.xlane.xlu0 %1520 }
 0x7ba   :  { %v1522_v54 = vmul.f32 %v4488_v63, %v1521_v37 }
 0x7bb   :  { %1414 = vmatmul.mubr.f32.vlgmr.msra.gmra.mrb[14].mxu0 %v1348_v39  ;;  %1485 = vmatmul.mubr.f32.vlgmr.msra.gmra.mrb[14].mxu1 %v1348_v39 }
 0x7bc   :  { %3530 = vmatpush1.bf16.msra.mxu0 %v4388_v17  ;;  %3562 = vmatpush1.bf16.msra.mxu1 %v4390_v18  ;;  %v1523_v39 = vadd.f32 %v4491_v0, %v1522_v54 }
 0x7bd   :  { %3532 = vmatprep.subr.bf16.mxu0 %v4393_v22  ;;  %3564 = vmatprep.subr.bf16.mxu1 %v4397_v26 }
 0x7be   :  { %1589 = vmatprep.mubr.f32.mxu0 %v4332_v1  ;;  %1660 = vmatprep.mubr.f32.mxu1 %v4332_v1 }
 0x7c0   :  { %3534 = vmatpush1.bf16.msra.mxu0 %v4399_v27  ;;  %3566 = vmatpush1.bf16.msra.mxu1 %v4402_v31 }
 0x7c1   :  { %3536 = vmatprep.subr.bf16.mxu0 %v4405_v35  ;;  %3568 = vmatprep.subr.bf16.mxu1 %v4407_v36 }
 0x7c4   :  { %3538 = vmatpush1.bf16.msra.mxu0 %v4411_v43  ;;  %3570 = vmatpush1.bf16.msra.mxu1 %v4413_v44 }
 0x7c5   :  { %3540 = vmatprep.subr.bf16.mxu0 %v4417_v48  ;;  %3572 = vmatprep.subr.bf16.mxu1 %v4419_v49 }
 0x7c8   :  { %3542 = vmatpush1.bf16.msra.mxu0 %v4423_v57  ;;  %3574 = vmatpush1.bf16.msra.mxu1 %v4425_v58 }
 0x7c9   :  { %3544 = vmatprep.subr.bf16.mxu0 %v4429_v61  ;;  %3576 = vmatprep.subr.bf16.mxu1 %v4431_v62 }
 0x7cc   :  { %3546 = vmatpush1.bf16.msra.mxu0 %v4435_v9  ;;  %3578 = vmatpush1.bf16.msra.mxu1 %v4437_v10 }
 0x7cd   :  { %3548 = vmatprep.subr.bf16.mxu0 %v4441_v14  ;;  %3580 = vmatprep.subr.bf16.mxu1 %v4443_v15 }
 0x7d0   :  { %3550 = vmatpush1.bf16.msra.mxu0 %v4447_v25  ;;  %3582 = vmatpush1.bf16.msra.mxu1 %v4449_v28 }
 0x7d1   :  { %3552 = vmatprep.subr.bf16.mxu0 %v4453_v32  ;;  %3584 = vmatprep.subr.bf16.mxu1 %v4455_v33 }
 0x7d4   :  { %3554 = vmatpush1.bf16.msra.mxu0 %v4462_v46  ;;  %3586 = vmatpush1.bf16.msra.mxu1 %v4464_v47 }
 0x7d5   :  { %3556 = vmatprep.subr.bf16.mxu0 %v4468_v51  ;;  %3588 = vmatprep.subr.bf16.mxu1 %v4470_v52 }
 0x7d8   :  { %3558 = vmatpush1.bf16.msra.mxu0 %v4475_v59  ;;  %3590 = vmatpush1.bf16.msra.mxu1 %v4477_v60 }
 0x7d9   :  { %3592 = vmatprep.subr.bf16.mxu0 %v4382_v8  ;;  %3624 = vmatprep.subr.bf16.mxu1 %v4384_v12 }
 0x88e   :  { %v1415_v42 = vpop.f32.mrb[14].mxu0  ;;  %v1486_v45 = vpop.f32.mrb[14].mxu1 }
 0x88f   :  { %v2978_v50 = vmul.f32 -1.442695, %v1415_v42  ;;  %v1417_v53 = vpop.f32.mrb[15].mxu0  ;;  %v1488_v55 = vpop.f32.mrb[15].mxu1  ;;  %v2980_v56 = vmul.f32 -1.442695, %v1486_v45 }
 0x890   :  { %v2979_v4 = vmul.f32 -1.442695, %v1417_v53 }
 0x891   :  { %4155 = vpow2.f32 %v2978_v50 }
 0x892   :  { %4157 = vpow2.f32 %v2979_v4 }
 0x893   :  { %4159 = vtanh.f32 %v1488_v55 }
 0x894   :  { %4161 = vpow2.f32 %v2980_v56 }
 0x89b   :  { %v4156_v5 = vpop.eup %4155 }
 0x89c   :  { %v1500_v6 = vadd.f32 1.0, %v4156_v5  ;;  %v4158_v11 = vpop.eup %4157 }
 0x89d   :  { %v1501_v13 = vadd.f32 1.0, %v4158_v11  ;;  %v4160_v19 = vpop.eup %4159 }
 0x89e   :  { %4163 = vrcp.f32 %v1500_v6  ;;  %v4162_v20 = vpop.eup %4161 }
 0x89f   :  { %4165 = vrcp.f32 %v1501_v13  ;;  %v1502_v29 = vadd.f32 1.0, %v4162_v20 }
 0x8a1   :  { %4167 = vrcp.f32 %v1502_v29 }
 0x8a8   :  { %v4164_v21 = vpop.eup %4163 }
 0x8a9   :  { %v1511_v23 = vmul.f32 %v4164_v21, %v4160_v19  ;;  %v4166_v24 = vpop.eup %4165 }
 0x8aa   :  { %v1510_v16 = vmul.f32 %v4166_v24, %v4802_v7  ;;  %v2989_v7 = vsel %vm1867_vm13, 1.0, %v4332_v1 }
 0x8ab   :  { %v4168_v38 = vpop.eup %4167  ;;  %v1870_v42 = vmul.f32 %v4753_v30, %v2989_v7 }
 0x8ac   :  { %v4846_v34 = vadd.f32 %v1511_v23, %v1510_v16 }
 0x8ad   :  { %v1871_v45 = vsel %vm110_vm1, %v1870_v42, 0.0 }
 0x8ae   :  { %4169 = vtanh.f32 %v4846_v34  ;;  %1872 = vadd.xlane.f32.xlu0 %v1871_v45 }
 0x8b8   :  { %v4170_v3 = vpop.eup %4169 }
 0x8b9   :  { %v1514_v40 = vmul.f32 %v4170_v3, %v4168_v38 }
 0x8bb   :  { %v1524_v41 = vadd.f32 %v1523_v39, %v1514_v40  ;;  %v1697_v39 = vpop.xlane.xlu1 %1696 }
 0x8bc   :  { %v1698_v3 = vmul.f32 %v4488_v63, %v1697_v39 }
 0x8bd   :  { %1590 = vmatmul.mubr.f32.vlgmr.msra.gmra.mrb[16].mxu0 %v1524_v41  ;;  %1661 = vmatmul.mubr.f32.vlgmr.msra.gmra.mrb[16].mxu1 %v1524_v41 }
 0x8be   :  { %3594 = vmatpush1.bf16.msra.mxu0 %v4388_v17  ;;  %3626 = vmatpush1.bf16.msra.mxu1 %v4390_v18  ;;  %v1699_v41 = vadd.f32 %v4491_v0, %v1698_v3 }
 0x8bf   :  { %3596 = vmatprep.subr.bf16.mxu0 %v4393_v22  ;;  %3628 = vmatprep.subr.bf16.mxu1 %v4397_v26 }
 0x8c0   :  { %1765 = vmatprep.mubr.f32.mxu0 %v4332_v1  ;;  %1836 = vmatprep.mubr.f32.mxu1 %v4332_v1 }
 0x8c2   :  { %3598 = vmatpush1.bf16.msra.mxu0 %v4399_v27  ;;  %3630 = vmatpush1.bf16.msra.mxu1 %v4402_v31 }
 0x8c3   :  { %3600 = vmatprep.subr.bf16.mxu0 %v4405_v35  ;;  %3632 = vmatprep.subr.bf16.mxu1 %v4407_v36 }
 0x8c6   :  { %3602 = vmatpush1.bf16.msra.mxu0 %v4411_v43  ;;  %3634 = vmatpush1.bf16.msra.mxu1 %v4413_v44 }
 0x8c7   :  { %3604 = vmatprep.subr.bf16.mxu0 %v4417_v48  ;;  %3636 = vmatprep.subr.bf16.mxu1 %v4419_v49 }
 0x8ca   :  { %3606 = vmatpush1.bf16.msra.mxu0 %v4423_v57  ;;  %3638 = vmatpush1.bf16.msra.mxu1 %v4425_v58 }
 0x8cb   :  { %3608 = vmatprep.subr.bf16.mxu0 %v4429_v61  ;;  %3640 = vmatprep.subr.bf16.mxu1 %v4431_v62 }
 0x8ce   :  { %3610 = vmatpush1.bf16.msra.mxu0 %v4435_v9  ;;  %3642 = vmatpush1.bf16.msra.mxu1 %v4437_v10 }
 0x8cf   :  { %3612 = vmatprep.subr.bf16.mxu0 %v4441_v14  ;;  %3644 = vmatprep.subr.bf16.mxu1 %v4443_v15 }
 0x8d2   :  { %3614 = vmatpush1.bf16.msra.mxu0 %v4447_v25  ;;  %3646 = vmatpush1.bf16.msra.mxu1 %v4449_v28 }
 0x8d3   :  { %3616 = vmatprep.subr.bf16.mxu0 %v4453_v32  ;;  %3648 = vmatprep.subr.bf16.mxu1 %v4455_v33 }
 0x8d6   :  { %3618 = vmatpush1.bf16.msra.mxu0 %v4462_v46  ;;  %3650 = vmatpush1.bf16.msra.mxu1 %v4464_v47 }
 0x8d7   :  { %3620 = vmatprep.subr.bf16.mxu0 %v4468_v51  ;;  %3652 = vmatprep.subr.bf16.mxu1 %v4470_v52 }
 0x8da   :  { %3622 = vmatpush1.bf16.msra.mxu0 %v4475_v59  ;;  %3654 = vmatpush1.bf16.msra.mxu1 %v4477_v60 }
 0x8db   :  { %3656 = vmatprep.subr.bf16.mxu0 %v4382_v8  ;;  %3688 = vmatprep.subr.bf16.mxu1 %v4384_v12 }
 0x990   :  { %v1591_v50 = vpop.f32.mrb[16].mxu0  ;;  %v1662_v53 = vpop.f32.mrb[16].mxu1 }
 0x991   :  { %v2982_v55 = vmul.f32 -1.442695, %v1591_v50  ;;  %v1593_v4 = vpop.f32.mrb[17].mxu0  ;;  %v1664_v56 = vpop.f32.mrb[17].mxu1  ;;  %v2984_v6 = vmul.f32 -1.442695, %v1662_v53 }
 0x992   :  { %v2983_v5 = vmul.f32 -1.442695, %v1593_v4 }
 0x993   :  { %4171 = vpow2.f32 %v2982_v55 }
 0x994   :  { %4173 = vpow2.f32 %v2983_v5 }
 0x995   :  { %4175 = vtanh.f32 %v1664_v56 }
 0x996   :  { %4177 = vpow2.f32 %v2984_v6 }
 0x99d   :  { %v4172_v11 = vpop.eup %4171 }
 0x99e   :  { %v1676_v13 = vadd.f32 1.0, %v4172_v11  ;;  %v4174_v19 = vpop.eup %4173 }
 0x99f   :  { %v1677_v20 = vadd.f32 1.0, %v4174_v19  ;;  %v4176_v21 = vpop.eup %4175 }
 0x9a0   :  { %4179 = vrcp.f32 %v1676_v13  ;;  %v4178_v23 = vpop.eup %4177 }
 0x9a1   :  { %4181 = vrcp.f32 %v1677_v20  ;;  %v1678_v37 = vadd.f32 1.0, %v4178_v23 }
 0x9a3   :  { %4183 = vrcp.f32 %v1678_v37 }
 0x9aa   :  { %v4180_v24 = vpop.eup %4179 }
 0x9ab   :  { %v1687_v29 = vmul.f32 %v4180_v24, %v4176_v21  ;;  %v4182_v16 = vpop.eup %4181 }
 0x9ac   :  { %v1686_v54 = vmul.f32 %v4182_v16, %v4846_v34  ;;  %v2993_v34 = vsel %vm2043_vm14, 1.0, %v4332_v1 }
 0x9ad   :  { %v4184_v40 = vpop.eup %4183  ;;  %v2046_v50 = vmul.f32 %v4753_v30, %v2993_v34 }
 0x9ae   :  { %v4890_v38 = vadd.f32 %v1687_v29, %v1686_v54 }
 0x9af   :  { %v2047_v53 = vsel %vm110_vm1, %v2046_v50, 0.0 }
 0x9b0   :  { %4185 = vtanh.f32 %v4890_v38  ;;  %2048 = vadd.xlane.f32.xlu1 %v2047_v53 }
 0x9ba   :  { %v4186_v7 = vpop.eup %4185 }
 0x9bb   :  { %v1690_v42 = vmul.f32 %v4186_v7, %v4184_v40 }
 0x9bd   :  { %v1700_v45 = vadd.f32 %v1699_v41, %v1690_v42  ;;  %v1873_v41 = vpop.xlane.xlu0 %1872 }
 0x9be   :  { %v1874_v7 = vmul.f32 %v4488_v63, %v1873_v41 }
 0x9bf   :  { %1766 = vmatmul.mubr.f32.vlgmr.msra.gmra.mrb[18].mxu0 %v1700_v45  ;;  %1837 = vmatmul.mubr.f32.vlgmr.msra.gmra.mrb[18].mxu1 %v1700_v45 }
 0x9c0   :  { %3658 = vmatpush1.bf16.msra.mxu0 %v4388_v17  ;;  %3690 = vmatpush1.bf16.msra.mxu1 %v4390_v18  ;;  %v1875_v45 = vadd.f32 %v4491_v0, %v1874_v7 }
 0x9c1   :  { %3660 = vmatprep.subr.bf16.mxu0 %v4393_v22  ;;  %3692 = vmatprep.subr.bf16.mxu1 %v4397_v26 }
 0x9c2   :  { %1941 = vmatprep.mubr.f32.mxu0 %v4332_v1  ;;  %2012 = vmatprep.mubr.f32.mxu1 %v4332_v1 }
 0x9c4   :  { %3662 = vmatpush1.bf16.msra.mxu0 %v4399_v27  ;;  %3694 = vmatpush1.bf16.msra.mxu1 %v4402_v31 }
 0x9c5   :  { %3664 = vmatprep.subr.bf16.mxu0 %v4405_v35  ;;  %3696 = vmatprep.subr.bf16.mxu1 %v4407_v36 }
 0x9c8   :  { %3666 = vmatpush1.bf16.msra.mxu0 %v4411_v43  ;;  %3698 = vmatpush1.bf16.msra.mxu1 %v4413_v44 }
 0x9c9   :  { %3668 = vmatprep.subr.bf16.mxu0 %v4417_v48  ;;  %3700 = vmatprep.subr.bf16.mxu1 %v4419_v49 }
 0x9cc   :  { %3670 = vmatpush1.bf16.msra.mxu0 %v4423_v57  ;;  %3702 = vmatpush1.bf16.msra.mxu1 %v4425_v58 }
 0x9cd   :  { %3672 = vmatprep.subr.bf16.mxu0 %v4429_v61  ;;  %3704 = vmatprep.subr.bf16.mxu1 %v4431_v62 }
 0x9d0   :  { %3674 = vmatpush1.bf16.msra.mxu0 %v4435_v9  ;;  %3706 = vmatpush1.bf16.msra.mxu1 %v4437_v10 }
 0x9d1   :  { %3676 = vmatprep.subr.bf16.mxu0 %v4441_v14  ;;  %3708 = vmatprep.subr.bf16.mxu1 %v4443_v15 }
 0x9d4   :  { %3678 = vmatpush1.bf16.msra.mxu0 %v4447_v25  ;;  %3710 = vmatpush1.bf16.msra.mxu1 %v4449_v28 }
 0x9d5   :  { %3680 = vmatprep.subr.bf16.mxu0 %v4453_v32  ;;  %3712 = vmatprep.subr.bf16.mxu1 %v4455_v33 }
 0x9d8   :  { %3682 = vmatpush1.bf16.msra.mxu0 %v4462_v46  ;;  %3714 = vmatpush1.bf16.msra.mxu1 %v4464_v47 }
 0x9d9   :  { %3684 = vmatprep.subr.bf16.mxu0 %v4468_v51  ;;  %3716 = vmatprep.subr.bf16.mxu1 %v4470_v52 }
 0x9dc   :  { %3686 = vmatpush1.bf16.msra.mxu0 %v4475_v59  ;;  %3718 = vmatpush1.bf16.msra.mxu1 %v4477_v60 }
 0x9dd   :  { %3720 = vmatprep.subr.bf16.mxu0 %v4382_v8  ;;  %3752 = vmatprep.subr.bf16.mxu1 %v4384_v12 }
 0xa92   :  { %v1767_v55 = vpop.f32.mrb[18].mxu0  ;;  %v1838_v4 = vpop.f32.mrb[18].mxu1 }
 0xa93   :  { %v2986_v56 = vmul.f32 -1.442695, %v1767_v55  ;;  %v1769_v5 = vpop.f32.mrb[19].mxu0  ;;  %v1840_v6 = vpop.f32.mrb[19].mxu1  ;;  %v2988_v13 = vmul.f32 -1.442695, %v1838_v4 }
 0xa94   :  { %v2987_v11 = vmul.f32 -1.442695, %v1769_v5 }
 0xa95   :  { %4187 = vpow2.f32 %v2986_v56 }
 0xa96   :  { %4189 = vpow2.f32 %v2987_v11 }
 0xa97   :  { %4191 = vtanh.f32 %v1840_v6 }
 0xa98   :  { %4193 = vpow2.f32 %v2988_v13 }
 0xa9f   :  { %v4188_v19 = vpop.eup %4187 }
 0xaa0   :  { %v1852_v20 = vadd.f32 1.0, %v4188_v19  ;;  %v4190_v21 = vpop.eup %4189 }
 0xaa1   :  { %v1853_v23 = vadd.f32 1.0, %v4190_v21  ;;  %v4192_v24 = vpop.eup %4191 }
 0xaa2   :  { %4195 = vrcp.f32 %v1852_v20  ;;  %v4194_v29 = vpop.eup %4193 }
 0xaa3   :  { %4197 = vrcp.f32 %v1853_v23  ;;  %v1854_v39 = vadd.f32 1.0, %v4194_v29 }
 0xaa5   :  { %4199 = vrcp.f32 %v1854_v39 }
 0xaac   :  { %v4196_v16 = vpop.eup %4195 }
 0xaad   :  { %v1863_v37 = vmul.f32 %v4196_v16, %v4192_v24  ;;  %v4198_v54 = vpop.eup %4197 }
 0xaae   :  { %v1862_v3 = vmul.f32 %v4198_v54, %v4890_v38  ;;  %v2997_v38 = vsel %vm2219_vm15, 1.0, %v4332_v1 }
 0xaaf   :  { %v4200_v42 = vpop.eup %4199  ;;  %v2222_v55 = vmul.f32 %v4753_v30, %v2997_v38 }
 0xab0   :  { %v4934_v40 = vadd.f32 %v1863_v37, %v1862_v3 }
 0xab1   :  { %v2223_v4 = vsel %vm110_vm1, %v2222_v55, 0.0 }
 0xab2   :  { %4201 = vtanh.f32 %v4934_v40  ;;  %2224 = vadd.xlane.f32.xlu0 %v2223_v4 }
 0xabc   :  { %v4202_v34 = vpop.eup %4201 }
 0xabd   :  { %v1866_v50 = vmul.f32 %v4202_v34, %v4200_v42 }
 0xabf   :  { %v1876_v53 = vadd.f32 %v1875_v45, %v1866_v50  ;;  %v2049_v45 = vpop.xlane.xlu1 %2048 }
 0xac0   :  { %v2050_v34 = vmul.f32 %v4488_v63, %v2049_v45 }
 0xac1   :  { %1942 = vmatmul.mubr.f32.vlgmr.msra.gmra.mrb[20].mxu0 %v1876_v53  ;;  %2013 = vmatmul.mubr.f32.vlgmr.msra.gmra.mrb[20].mxu1 %v1876_v53 }
 0xac2   :  { %3722 = vmatpush1.bf16.msra.mxu0 %v4388_v17  ;;  %3754 = vmatpush1.bf16.msra.mxu1 %v4390_v18  ;;  %v2051_v53 = vadd.f32 %v4491_v0, %v2050_v34 }
 0xac3   :  { %3724 = vmatprep.subr.bf16.mxu0 %v4393_v22  ;;  %3756 = vmatprep.subr.bf16.mxu1 %v4397_v26 }
 0xac4   :  { %2117 = vmatprep.mubr.f32.mxu0 %v4332_v1  ;;  %2188 = vmatprep.mubr.f32.mxu1 %v4332_v1 }
 0xac6   :  { %3726 = vmatpush1.bf16.msra.mxu0 %v4399_v27  ;;  %3758 = vmatpush1.bf16.msra.mxu1 %v4402_v31 }
 0xac7   :  { %3728 = vmatprep.subr.bf16.mxu0 %v4405_v35  ;;  %3760 = vmatprep.subr.bf16.mxu1 %v4407_v36 }
 0xaca   :  { %3730 = vmatpush1.bf16.msra.mxu0 %v4411_v43  ;;  %3762 = vmatpush1.bf16.msra.mxu1 %v4413_v44 }
 0xacb   :  { %3732 = vmatprep.subr.bf16.mxu0 %v4417_v48  ;;  %3764 = vmatprep.subr.bf16.mxu1 %v4419_v49 }
 0xace   :  { %3734 = vmatpush1.bf16.msra.mxu0 %v4423_v57  ;;  %3766 = vmatpush1.bf16.msra.mxu1 %v4425_v58 }
 0xacf   :  { %3736 = vmatprep.subr.bf16.mxu0 %v4429_v61  ;;  %3768 = vmatprep.subr.bf16.mxu1 %v4431_v62 }
 0xad2   :  { %3738 = vmatpush1.bf16.msra.mxu0 %v4435_v9  ;;  %3770 = vmatpush1.bf16.msra.mxu1 %v4437_v10 }
 0xad3   :  { %3740 = vmatprep.subr.bf16.mxu0 %v4441_v14  ;;  %3772 = vmatprep.subr.bf16.mxu1 %v4443_v15 }
 0xad6   :  { %3742 = vmatpush1.bf16.msra.mxu0 %v4447_v25  ;;  %3774 = vmatpush1.bf16.msra.mxu1 %v4449_v28 }
 0xad7   :  { %3744 = vmatprep.subr.bf16.mxu0 %v4453_v32  ;;  %3776 = vmatprep.subr.bf16.mxu1 %v4455_v33 }
 0xada   :  { %3746 = vmatpush1.bf16.msra.mxu0 %v4462_v46  ;;  %3778 = vmatpush1.bf16.msra.mxu1 %v4464_v47 }
 0xadb   :  { %3748 = vmatprep.subr.bf16.mxu0 %v4468_v51  ;;  %3780 = vmatprep.subr.bf16.mxu1 %v4470_v52 }
 0xade   :  { %3750 = vmatpush1.bf16.msra.mxu0 %v4475_v59  ;;  %3782 = vmatpush1.bf16.msra.mxu1 %v4477_v60 }
 0xadf   :  { %3784 = vmatprep.subr.bf16.mxu0 %v4382_v8  ;;  %3816 = vmatprep.subr.bf16.mxu1 %v4384_v12 }
 0xb94   :  { %v1943_v56 = vpop.f32.mrb[20].mxu0  ;;  %v2014_v5 = vpop.f32.mrb[20].mxu1 }
 0xb95   :  { %v2990_v6 = vmul.f32 -1.442695, %v1943_v56  ;;  %v1945_v11 = vpop.f32.mrb[21].mxu0  ;;  %v2016_v13 = vpop.f32.mrb[21].mxu1  ;;  %v2992_v20 = vmul.f32 -1.442695, %v2014_v5 }
 0xb96   :  { %v2991_v19 = vmul.f32 -1.442695, %v1945_v11 }
 0xb97   :  { %4203 = vpow2.f32 %v2990_v6 }
 0xb98   :  { %4205 = vpow2.f32 %v2991_v19 }
 0xb99   :  { %4207 = vtanh.f32 %v2016_v13 }
 0xb9a   :  { %4209 = vpow2.f32 %v2992_v20 }
 0xba1   :  { %v4204_v21 = vpop.eup %4203 }
 0xba2   :  { %v2028_v23 = vadd.f32 1.0, %v4204_v21  ;;  %v4206_v24 = vpop.eup %4205 }
 0xba3   :  { %v2029_v29 = vadd.f32 1.0, %v4206_v24  ;;  %v4208_v16 = vpop.eup %4207 }
 0xba4   :  { %4211 = vrcp.f32 %v2028_v23  ;;  %v4210_v37 = vpop.eup %4209 }
 0xba5   :  { %4213 = vrcp.f32 %v2029_v29  ;;  %v2030_v41 = vadd.f32 1.0, %v4210_v37 }
 0xba7   :  { %4215 = vrcp.f32 %v2030_v41 }
 0xbae   :  { %v4212_v54 = vpop.eup %4211 }
 0xbaf   :  { %v2039_v39 = vmul.f32 %v4212_v54, %v4208_v16  ;;  %v4214_v3 = vpop.eup %4213 }
 0xbb0   :  { %v2038_v7 = vmul.f32 %v4214_v3, %v4934_v40  ;;  %v3001_v40 = vsel %vm2395_vm0, 1.0, %v4332_v1 }
 0xbb1   :  { %v4216_v50 = vpop.eup %4215  ;;  %v2398_v56 = vmul.f32 %v4753_v30, %v3001_v40 }
 0xbb2   :  { %v4978_v42 = vadd.f32 %v2039_v39, %v2038_v7 }
 0xbb3   :  { %v2399_v5 = vsel %vm110_vm1, %v2398_v56, 0.0 }
 0xbb4   :  { %4217 = vtanh.f32 %v4978_v42  ;;  %2400 = vadd.xlane.f32.xlu1 %v2399_v5  ;;  %v5066_v5 = vld [vmem:[%s5164_s0] sm:$0xff] }
 0xbbe   :  { %v4218_v38 = vpop.eup %4217 }
 0xbbf   :  { %v2042_v55 = vmul.f32 %v4218_v38, %v4216_v50  ;;  %v2225_v50 = vpop.xlane.xlu0 %2224 }
 0xbc1   :  { %v2052_v4 = vadd.f32 %v2051_v53, %v2042_v55  ;;  %v2226_v53 = vmul.f32 %v4488_v63, %v2225_v50 }
 0xbc3   :  { %2118 = vmatmul.mubr.f32.vlgmr.msra.gmra.mrb[22].mxu0 %v2052_v4  ;;  %2189 = vmatmul.mubr.f32.vlgmr.msra.gmra.mrb[22].mxu1 %v2052_v4  ;;  %v2227_v55 = vadd.f32 %v4491_v0, %v2226_v53 }
 0xbc4   :  { %3786 = vmatpush1.bf16.msra.mxu0 %v4388_v17  ;;  %3818 = vmatpush1.bf16.msra.mxu1 %v4390_v18 }
 0xbc5   :  { %3788 = vmatprep.subr.bf16.mxu0 %v4393_v22  ;;  %3820 = vmatprep.subr.bf16.mxu1 %v4397_v26 }
 0xbc6   :  { %2293 = vmatprep.mubr.f32.mxu0 %v4332_v1  ;;  %2364 = vmatprep.mubr.f32.mxu1 %v4332_v1 }
 0xbc8   :  { %3790 = vmatpush1.bf16.msra.mxu0 %v4399_v27  ;;  %3822 = vmatpush1.bf16.msra.mxu1 %v4402_v31 }
 0xbc9   :  { %3792 = vmatprep.subr.bf16.mxu0 %v4405_v35  ;;  %3824 = vmatprep.subr.bf16.mxu1 %v4407_v36 }
 0xbcc   :  { %3794 = vmatpush1.bf16.msra.mxu0 %v4411_v43  ;;  %3826 = vmatpush1.bf16.msra.mxu1 %v4413_v44 }
 0xbcd   :  { %3796 = vmatprep.subr.bf16.mxu0 %v4417_v48  ;;  %3828 = vmatprep.subr.bf16.mxu1 %v4419_v49 }
 0xbd0   :  { %3798 = vmatpush1.bf16.msra.mxu0 %v4423_v57  ;;  %3830 = vmatpush1.bf16.msra.mxu1 %v4425_v58 }
 0xbd1   :  { %3800 = vmatprep.subr.bf16.mxu0 %v4429_v61  ;;  %3832 = vmatprep.subr.bf16.mxu1 %v4431_v62 }
 0xbd4   :  { %3802 = vmatpush1.bf16.msra.mxu0 %v4435_v9  ;;  %3834 = vmatpush1.bf16.msra.mxu1 %v4437_v10 }
 0xbd5   :  { %3804 = vmatprep.subr.bf16.mxu0 %v4441_v14  ;;  %3836 = vmatprep.subr.bf16.mxu1 %v4443_v15 }
 0xbd8   :  { %3806 = vmatpush1.bf16.msra.mxu0 %v4447_v25  ;;  %3838 = vmatpush1.bf16.msra.mxu1 %v4449_v28 }
 0xbd9   :  { %3808 = vmatprep.subr.bf16.mxu0 %v4453_v32  ;;  %3840 = vmatprep.subr.bf16.mxu1 %v4455_v33 }
 0xbdc   :  { %3810 = vmatpush1.bf16.msra.mxu0 %v4462_v46  ;;  %3842 = vmatpush1.bf16.msra.mxu1 %v4464_v47 }
 0xbdd   :  { %3812 = vmatprep.subr.bf16.mxu0 %v4468_v51  ;;  %3844 = vmatprep.subr.bf16.mxu1 %v4470_v52 }
 0xbe0   :  { %3814 = vmatpush1.bf16.msra.mxu0 %v4475_v59  ;;  %3846 = vmatpush1.bf16.msra.mxu1 %v4477_v60 }
 0xbe1   :  { %3848 = vmatprep.subr.bf16.mxu0 %v4382_v8  ;;  %3880 = vmatprep.subr.bf16.mxu1 %v4384_v12 }
 0xc96   :  { %v2119_v6 = vpop.f32.mrb[22].mxu0  ;;  %v2190_v11 = vpop.f32.mrb[22].mxu1 }
 0xc97   :  { %v2994_v13 = vmul.f32 -1.442695, %v2119_v6  ;;  %v2121_v19 = vpop.f32.mrb[23].mxu0  ;;  %v2192_v20 = vpop.f32.mrb[23].mxu1  ;;  %v2996_v23 = vmul.f32 -1.442695, %v2190_v11 }
 0xc98   :  { %v2995_v21 = vmul.f32 -1.442695, %v2121_v19 }
 0xc99   :  { %4219 = vpow2.f32 %v2994_v13 }
 0xc9a   :  { %4221 = vpow2.f32 %v2995_v21 }
 0xc9b   :  { %4223 = vtanh.f32 %v2192_v20 }
 0xc9c   :  { %4225 = vpow2.f32 %v2996_v23 }
 0xca3   :  { %v4220_v24 = vpop.eup %4219 }
 0xca4   :  { %v2204_v29 = vadd.f32 1.0, %v4220_v24  ;;  %v4222_v16 = vpop.eup %4221 }
 0xca5   :  { %v2205_v37 = vadd.f32 1.0, %v4222_v16  ;;  %v4224_v30 = vpop.eup %4223 }
 0xca6   :  { %4227 = vrcp.f32 %v2204_v29  ;;  %v4226_v54 = vpop.eup %4225 }
 0xca7   :  { %4229 = vrcp.f32 %v2205_v37  ;;  %v2206_v7 = vadd.f32 1.0, %v4226_v54 }
 0xca9   :  { %4231 = vrcp.f32 %v2206_v7 }
 0xcb0   :  { %v4228_v39 = vpop.eup %4227 }
 0xcb1   :  { %v2215_v3 = vmul.f32 %v4228_v39, %v4224_v30  ;;  %v4230_v41 = vpop.eup %4229 }
 0xcb2   :  { %v2214_v45 = vmul.f32 %v4230_v41, %v4978_v42  ;;  %v3005_v42 = vsel %vm2571_vm2, 1.0, %v4332_v1 }
 0xcb3   :  { %v4232_v38 = vpop.eup %4231  ;;  %v2574_v6 = vmul.f32 %v5066_v5, %v3005_v42 }
 0xcb4   :  { %v5022_v34 = vadd.f32 %v2215_v3, %v2214_v45 }
 0xcb5   :  { %v2575_v11 = vsel %vm110_vm1, %v2574_v6, 0.0 }
 0xcb6   :  { %4233 = vtanh.f32 %v5022_v34  ;;  %2576 = vadd.xlane.f32.xlu0 %v2575_v11 }
 0xcc0   :  { %v4234_v4 = vpop.eup %4233 }
 0xcc1   :  { %v2218_v40 = vmul.f32 %v4234_v4, %v4232_v38 }
 0xcc3   :  { %v2228_v56 = vadd.f32 %v2227_v55, %v2218_v40  ;;  %v2401_v55 = vpop.xlane.xlu1 %2400 }
 0xcc4   :  { %v2402_v4 = vmul.f32 %v4488_v63, %v2401_v55 }
 0xcc5   :  { %2294 = vmatmul.mubr.f32.vlgmr.msra.gmra.mrb[24].mxu0 %v2228_v56  ;;  %2365 = vmatmul.mubr.f32.vlgmr.msra.gmra.mrb[24].mxu1 %v2228_v56 }
 0xcc6   :  { %3850 = vmatpush1.bf16.msra.mxu0 %v4388_v17  ;;  %3882 = vmatpush1.bf16.msra.mxu1 %v4390_v18  ;;  %v2403_v56 = vadd.f32 %v4491_v0, %v2402_v4 }
 0xcc7   :  { %3852 = vmatprep.subr.bf16.mxu0 %v4393_v22  ;;  %3884 = vmatprep.subr.bf16.mxu1 %v4397_v26 }
 0xcc8   :  { %2469 = vmatprep.mubr.f32.mxu0 %v4332_v1  ;;  %2540 = vmatprep.mubr.f32.mxu1 %v4332_v1 }
 0xcca   :  { %3854 = vmatpush1.bf16.msra.mxu0 %v4399_v27  ;;  %3886 = vmatpush1.bf16.msra.mxu1 %v4402_v31 }
 0xccb   :  { %3856 = vmatprep.subr.bf16.mxu0 %v4405_v35  ;;  %3888 = vmatprep.subr.bf16.mxu1 %v4407_v36 }
 0xcce   :  { %3858 = vmatpush1.bf16.msra.mxu0 %v4411_v43  ;;  %3890 = vmatpush1.bf16.msra.mxu1 %v4413_v44 }
 0xccf   :  { %3860 = vmatprep.subr.bf16.mxu0 %v4417_v48  ;;  %3892 = vmatprep.subr.bf16.mxu1 %v4419_v49 }
 0xcd2   :  { %3862 = vmatpush1.bf16.msra.mxu0 %v4423_v57  ;;  %3894 = vmatpush1.bf16.msra.mxu1 %v4425_v58 }
 0xcd3   :  { %3864 = vmatprep.subr.bf16.mxu0 %v4429_v61  ;;  %3896 = vmatprep.subr.bf16.mxu1 %v4431_v62 }
 0xcd6   :  { %3866 = vmatpush1.bf16.msra.mxu0 %v4435_v9  ;;  %3898 = vmatpush1.bf16.msra.mxu1 %v4437_v10 }
 0xcd7   :  { %3868 = vmatprep.subr.bf16.mxu0 %v4441_v14  ;;  %3900 = vmatprep.subr.bf16.mxu1 %v4443_v15 }
 0xcda   :  { %3870 = vmatpush1.bf16.msra.mxu0 %v4447_v25  ;;  %3902 = vmatpush1.bf16.msra.mxu1 %v4449_v28 }
 0xcdb   :  { %3872 = vmatprep.subr.bf16.mxu0 %v4453_v32  ;;  %3904 = vmatprep.subr.bf16.mxu1 %v4455_v33 }
 0xcde   :  { %3874 = vmatpush1.bf16.msra.mxu0 %v4462_v46  ;;  %3906 = vmatpush1.bf16.msra.mxu1 %v4464_v47 }
 0xcdf   :  { %3876 = vmatprep.subr.bf16.mxu0 %v4468_v51  ;;  %3908 = vmatprep.subr.bf16.mxu1 %v4470_v52 }
 0xce2   :  { %3878 = vmatpush1.bf16.msra.mxu0 %v4475_v59  ;;  %3910 = vmatpush1.bf16.msra.mxu1 %v4477_v60 }
 0xce3   :  { %3912 = vmatprep.subr.bf16.mxu0 %v4382_v8  ;;  %3944 = vmatprep.subr.bf16.mxu1 %v4384_v12 }
 0xd98   :  { %v2295_v13 = vpop.f32.mrb[24].mxu0  ;;  %v2366_v19 = vpop.f32.mrb[24].mxu1 }
 0xd99   :  { %v2998_v20 = vmul.f32 -1.442695, %v2295_v13  ;;  %v2297_v21 = vpop.f32.mrb[25].mxu0  ;;  %v2368_v23 = vpop.f32.mrb[25].mxu1  ;;  %v3000_v29 = vmul.f32 -1.442695, %v2366_v19 }
 0xd9a   :  { %v2999_v24 = vmul.f32 -1.442695, %v2297_v21 }
 0xd9b   :  { %4235 = vpow2.f32 %v2998_v20 }
 0xd9c   :  { %4237 = vpow2.f32 %v2999_v24 }
 0xd9d   :  { %4239 = vtanh.f32 %v2368_v23 }
 0xd9e   :  { %4241 = vpow2.f32 %v3000_v29 }
 0xda5   :  { %v4236_v16 = vpop.eup %4235 }
 0xda6   :  { %v2380_v37 = vadd.f32 1.0, %v4236_v16  ;;  %v4238_v30 = vpop.eup %4237 }
 0xda7   :  { %v2381_v54 = vadd.f32 1.0, %v4238_v30  ;;  %v4240_v39 = vpop.eup %4239 }
 0xda8   :  { %4243 = vrcp.f32 %v2380_v37  ;;  %v4242_v3 = vpop.eup %4241 }
 0xda9   :  { %4245 = vrcp.f32 %v2381_v54  ;;  %v2382_v50 = vadd.f32 1.0, %v4242_v3 }
 0xdab   :  { %4247 = vrcp.f32 %v2382_v50 }
 0xdb2   :  { %v4244_v41 = vpop.eup %4243 }
 0xdb3   :  { %v2391_v7 = vmul.f32 %v4244_v41, %v4240_v39  ;;  %v4246_v45 = vpop.eup %4245 }
 0xdb4   :  { %v2390_v53 = vmul.f32 %v4246_v45, %v5022_v34  ;;  %v3009_v34 = vsel %vm2747_vm3, 1.0, %v4332_v1 }
 0xdb5   :  { %v4248_v40 = vpop.eup %4247  ;;  %v2750_v13 = vmul.f32 %v5066_v5, %v3009_v34 }
 0xdb6   :  { %v5071_v38 = vadd.f32 %v2391_v7, %v2390_v53  ;;  %v2577_v53 = vpop.xlane.xlu0 %2576 }
 0xdb7   :  { %v2751_v19 = vsel %vm110_vm1, %v2750_v13, 0.0  ;;  %v2578_v55 = vmul.f32 %v4488_v63, %v2577_v53 }
 0xdb8   :  { %4249 = vtanh.f32 %v5071_v38  ;;  %2752 = vadd.xlane.f32.xlu1 %v2751_v19 }
 0xdc2   :  { %v4250_v42 = vpop.eup %4249 }
 0xdc3   :  { %v2394_v6 = vmul.f32 %v4250_v42, %v4248_v40  ;;  %v2579_v40 = vadd.f32 %v4491_v0, %v2578_v55 }
 0xdc5   :  { %v2404_v11 = vadd.f32 %v2403_v56, %v2394_v6 }
 0xdc7   :  { %2470 = vmatmul.mubr.f32.vlgmr.msra.gmra.mrb[26].mxu0 %v2404_v11  ;;  %2541 = vmatmul.mubr.f32.vlgmr.msra.gmra.mrb[26].mxu1 %v2404_v11 }
 0xdc8   :  { %3914 = vmatpush1.bf16.msra.mxu0 %v4388_v17  ;;  %3946 = vmatpush1.bf16.msra.mxu1 %v4390_v18 }
 0xdc9   :  { %3916 = vmatprep.subr.bf16.mxu0 %v4393_v22  ;;  %3948 = vmatprep.subr.bf16.mxu1 %v4397_v26 }
 0xdca   :  { %2645 = vmatprep.mubr.f32.mxu0 %v4332_v1  ;;  %2716 = vmatprep.mubr.f32.mxu1 %v4332_v1 }
 0xdcc   :  { %3918 = vmatpush1.bf16.msra.mxu0 %v4399_v27  ;;  %3950 = vmatpush1.bf16.msra.mxu1 %v4402_v31 }
 0xdcd   :  { %3920 = vmatprep.subr.bf16.mxu0 %v4405_v35  ;;  %3952 = vmatprep.subr.bf16.mxu1 %v4407_v36 }
 0xdd0   :  { %3922 = vmatpush1.bf16.msra.mxu0 %v4411_v43  ;;  %3954 = vmatpush1.bf16.msra.mxu1 %v4413_v44 }
 0xdd1   :  { %3924 = vmatprep.subr.bf16.mxu0 %v4417_v48  ;;  %3956 = vmatprep.subr.bf16.mxu1 %v4419_v49 }
 0xdd4   :  { %3926 = vmatpush1.bf16.msra.mxu0 %v4423_v57  ;;  %3958 = vmatpush1.bf16.msra.mxu1 %v4425_v58 }
 0xdd5   :  { %3928 = vmatprep.subr.bf16.mxu0 %v4429_v61  ;;  %3960 = vmatprep.subr.bf16.mxu1 %v4431_v62 }
 0xdd8   :  { %3930 = vmatpush1.bf16.msra.mxu0 %v4435_v9  ;;  %3962 = vmatpush1.bf16.msra.mxu1 %v4437_v10 }
 0xdd9   :  { %3932 = vmatprep.subr.bf16.mxu0 %v4441_v14  ;;  %3964 = vmatprep.subr.bf16.mxu1 %v4443_v15 }
 0xddc   :  { %3934 = vmatpush1.bf16.msra.mxu0 %v4447_v25  ;;  %3966 = vmatpush1.bf16.msra.mxu1 %v4449_v28 }
 0xddd   :  { %3936 = vmatprep.subr.bf16.mxu0 %v4453_v32  ;;  %3968 = vmatprep.subr.bf16.mxu1 %v4455_v33 }
 0xde0   :  { %3938 = vmatpush1.bf16.msra.mxu0 %v4462_v46  ;;  %3970 = vmatpush1.bf16.msra.mxu1 %v4464_v47 }
 0xde1   :  { %3940 = vmatprep.subr.bf16.mxu0 %v4468_v51  ;;  %3972 = vmatprep.subr.bf16.mxu1 %v4470_v52 }
 0xde4   :  { %3942 = vmatpush1.bf16.msra.mxu0 %v4475_v59  ;;  %3974 = vmatpush1.bf16.msra.mxu1 %v4477_v60 }
 0xde5   :  { %3976 = vmatprep.subr.bf16.mxu0 %v4382_v8  ;;  %4008 = vmatprep.subr.bf16.mxu1 %v4384_v12 }
 0xe9a   :  { %v2471_v20 = vpop.f32.mrb[26].mxu0  ;;  %v2542_v21 = vpop.f32.mrb[26].mxu1 }
 0xe9b   :  { %v3002_v23 = vmul.f32 -1.442695, %v2471_v20  ;;  %v2473_v24 = vpop.f32.mrb[27].mxu0  ;;  %v2544_v29 = vpop.f32.mrb[27].mxu1  ;;  %v3004_v8 = vmul.f32 -1.442695, %v2542_v21 }
 0xe9c   :  { %v3003_v16 = vmul.f32 -1.442695, %v2473_v24 }
 0xe9d   :  { %4251 = vpow2.f32 %v3002_v23 }
 0xe9e   :  { %4253 = vpow2.f32 %v3003_v16 }
 0xe9f   :  { %4255 = vtanh.f32 %v2544_v29 }
 0xea0   :  { %4257 = vpow2.f32 %v3004_v8 }
 0xea7   :  { %v4252_v37 = vpop.eup %4251 }
 0xea8   :  { %v2556_v12 = vadd.f32 1.0, %v4252_v37  ;;  %v4254_v2 = vpop.eup %4253 }
 0xea9   :  { %v2557_v30 = vadd.f32 1.0, %v4254_v2  ;;  %v4256_v5 = vpop.eup %4255  ;;  %v3013_v2 = vld [vmem:[%s5166_s2] ss:$0 sm:$0xff] }
 0xeaa   :  { %4259 = vrcp.f32 %v2556_v12  ;;  %v4258_v54 = vpop.eup %4257 }
 0xeab   :  { %4261 = vrcp.f32 %v2557_v30  ;;  %v2558_v7 = vadd.f32 1.0, %v4258_v54  ;;  %v2933_v54 = vstv %s5167_s3 }
 0xead   :  { %4263 = vrcp.f32 %v2558_v7 }
 0xeb4   :  { %v4260_v39 = vpop.eup %4259 }
 0xeb5   :  { %v2567_v3 = vmul.f32 %v4260_v39, %v4256_v5  ;;  %v4262_v41 = vpop.eup %4261 }
 0xeb6   :  { %v2566_v45 = vmul.f32 %v4262_v41, %v5071_v38 }
 0xeb7   :  { %v4264_v4 = vpop.eup %4263 }
 0xeb8   :  { %v5115_v50 = vadd.f32 %v2567_v3, %v2566_v45 }
 0xeba   :  { %4265 = vtanh.f32 %v5115_v50 }
 0xec4   :  { %v4266_v56 = vpop.eup %4265 }
 0xec5   :  { %v2570_v42 = vmul.f32 %v4266_v56, %v4264_v4 }
 0xec7   :  { %v2580_v6 = vadd.f32 %v2579_v40, %v2570_v42 }
 0xec9   :  { %2646 = vmatmul.mubr.f32.vlgmr.msra.gmra.mrb[28].mxu0 %v2580_v6  ;;  %2717 = vmatmul.mubr.f32.vlgmr.msra.gmra.mrb[28].mxu1 %v2580_v6 }
 0xeca   :  { %3978 = vmatpush1.bf16.msra.mxu0 %v4388_v17  ;;  %4010 = vmatpush1.bf16.msra.mxu1 %v4390_v18 }
 0xecb   :  { %3980 = vmatprep.subr.bf16.mxu0 %v4393_v22  ;;  %4012 = vmatprep.subr.bf16.mxu1 %v4397_v26 }
 0xecc   :  { %2821 = vmatprep.mubr.f32.mxu0 %v4332_v1  ;;  %2892 = vmatprep.mubr.f32.mxu1 %v4332_v1 }
 0xece   :  { %3982 = vmatpush1.bf16.msra.mxu0 %v4399_v27  ;;  %4014 = vmatpush1.bf16.msra.mxu1 %v4402_v31 }
 0xecf   :  { %3984 = vmatprep.subr.bf16.mxu0 %v4405_v35  ;;  %4016 = vmatprep.subr.bf16.mxu1 %v4407_v36 }
 0xed2   :  { %3986 = vmatpush1.bf16.msra.mxu0 %v4411_v43  ;;  %4018 = vmatpush1.bf16.msra.mxu1 %v4413_v44 }
 0xed3   :  { %3988 = vmatprep.subr.bf16.mxu0 %v4417_v48  ;;  %4020 = vmatprep.subr.bf16.mxu1 %v4419_v49 }
 0xed6   :  { %3990 = vmatpush1.bf16.msra.mxu0 %v4423_v57  ;;  %4022 = vmatpush1.bf16.msra.mxu1 %v4425_v58 }
 0xed7   :  { %3992 = vmatprep.subr.bf16.mxu0 %v4429_v61  ;;  %4024 = vmatprep.subr.bf16.mxu1 %v4431_v62 }
 0xeda   :  { %3994 = vmatpush1.bf16.msra.mxu0 %v4435_v9  ;;  %4026 = vmatpush1.bf16.msra.mxu1 %v4437_v10 }
 0xedb   :  { %3996 = vmatprep.subr.bf16.mxu0 %v4441_v14  ;;  %4028 = vmatprep.subr.bf16.mxu1 %v4443_v15  ;;  %v2753_v14 = vpop.xlane.xlu1 %2752 }
 0xedc   :  { %v2754_v15 = vmul.f32 %v4488_v63, %v2753_v14 }
 0xede   :  { %3998 = vmatpush1.bf16.msra.mxu0 %v4447_v25  ;;  %4030 = vmatpush1.bf16.msra.mxu1 %v4449_v28  ;;  %v2755_v28 = vadd.f32 %v4491_v0, %v2754_v15 }
 0xedf   :  { %4000 = vmatprep.subr.bf16.mxu0 %v4453_v32  ;;  %4032 = vmatprep.subr.bf16.mxu1 %v4455_v33 }
 0xee2   :  { %4002 = vmatpush1.bf16.msra.mxu0 %v4462_v46  ;;  %4034 = vmatpush1.bf16.msra.mxu1 %v4464_v47 }
 0xee3   :  { %4004 = vmatprep.subr.bf16.mxu0 %v4468_v51  ;;  %4036 = vmatprep.subr.bf16.mxu1 %v4470_v52 }
 0xee6   :  { %4006 = vmatpush1.bf16.msra.mxu0 %v4475_v59  ;;  %4038 = vmatpush1.bf16.msra.mxu1 %v4477_v60 }
 0xf9c   :  { %v2647_v1 = vpop.f32.mrb[28].mxu0  ;;  %v2718_v17 = vpop.f32.mrb[28].mxu1 }
 0xf9d   :  { %v3006_v18 = vmul.f32 -1.442695, %v2647_v1  ;;  %v2649_v22 = vpop.f32.mrb[29].mxu0  ;;  %v2720_v26 = vpop.f32.mrb[29].mxu1  ;;  %v3008_v31 = vmul.f32 -1.442695, %v2718_v17 }
 0xf9e   :  { %v3007_v27 = vmul.f32 -1.442695, %v2649_v22 }
 0xf9f   :  { %4267 = vpow2.f32 %v3006_v18 }
 0xfa0   :  { %4269 = vpow2.f32 %v3007_v27 }
 0xfa1   :  { %4271 = vtanh.f32 %v2720_v26 }
 0xfa2   :  { %4273 = vpow2.f32 %v3008_v31 }
 0xfa9   :  { %v4268_v35 = vpop.eup %4267 }
 0xfaa   :  { %v2732_v36 = vadd.f32 1.0, %v4268_v35  ;;  %v4270_v43 = vpop.eup %4269 }
 0xfab   :  { %v2733_v44 = vadd.f32 1.0, %v4270_v43  ;;  %v4272_v48 = vpop.eup %4271 }
 0xfac   :  { %4275 = vrcp.f32 %v2732_v36  ;;  %v4274_v49 = vpop.eup %4273 }
 0xfad   :  { %4277 = vrcp.f32 %v2733_v44  ;;  %v2734_v62 = vadd.f32 1.0, %v4274_v49 }
 0xfaf   :  { %4279 = vrcp.f32 %v2734_v62 }
 0xfb6   :  { %v4276_v57 = vpop.eup %4275 }
 0xfb7   :  { %v2743_v58 = vmul.f32 %v4276_v57, %v4272_v48  ;;  %v4278_v61 = vpop.eup %4277 }
 0xfb8   :  { %v2742_v9 = vmul.f32 %v4278_v61, %v5115_v50 }
 0xfb9   :  { %v4280_v25 = vpop.eup %4279 }
 0xfba   :  { %v2744_v10 = vadd.f32 %v2743_v58, %v2742_v9 }
 0xfbc   :  { %4281 = vtanh.f32 %v2744_v10 }
 0xfc6   :  { %v4282_v32 = vpop.eup %4281 }
 0xfc7   :  { %v2746_v33 = vmul.f32 %v4282_v32, %v4280_v25 }
 0xfc9   :  { %v2756_v46 = vadd.f32 %v2755_v28, %v2746_v33 }
 0xfcb   :  { %2822 = vmatmul.mubr.f32.vlgmr.msra.gmra.mrb[30].mxu0 %v2756_v46  ;;  %2893 = vmatmul.mubr.f32.vlgmr.msra.gmra.mrb[30].mxu1 %v2756_v46 }
0x109e   :  { %v2823_v47 = vpop.f32.mrb[30].mxu0  ;;  %v2894_v51 = vpop.f32.mrb[30].mxu1 }
0x109f   :  { %v3010_v52 = vmul.f32 -1.442695, %v2823_v47  ;;  %v2825_v59 = vpop.f32.mrb[31].mxu0  ;;  %v2896_v60 = vpop.f32.mrb[31].mxu1  ;;  %v3012_v11 = vmul.f32 -1.442695, %v2894_v51 }
0x10a0   :  { %v3011_v38 = vmul.f32 -1.442695, %v2825_v59 }
0x10a1   :  { %4283 = vpow2.f32 %v3010_v52 }
0x10a2   :  { %4285 = vpow2.f32 %v3011_v38 }
0x10a3   :  { %4287 = vtanh.f32 %v2896_v60 }
0x10a4   :  { %4289 = vpow2.f32 %v3012_v11 }
0x10ab   :  { %v4284_v34 = vpop.eup %4283 }
0x10ac   :  { %v2908_v13 = vadd.f32 1.0, %v4284_v34  ;;  %v4286_v63 = vpop.eup %4285 }
0x10ad   :  { %v2909_v0 = vadd.f32 1.0, %v4286_v63  ;;  %v4288_v19 = vpop.eup %4287 }
0x10ae   :  { %4291 = vrcp.f32 %v2908_v13  ;;  %v4290_v20 = vpop.eup %4289 }
0x10af   :  { %4293 = vrcp.f32 %v2909_v0  ;;  %v2910_v29 = vadd.f32 1.0, %v4290_v20 }
0x10b1   :  { %4295 = vrcp.f32 %v2910_v29 }
0x10b8   :  { %v4292_v21 = vpop.eup %4291 }
0x10b9   :  { %v2919_v23 = vmul.f32 %v4292_v21, %v4288_v19  ;;  %v4294_v24 = vpop.eup %4293 }
0x10ba   :  { %v2918_v16 = vmul.f32 %v4294_v24, %v2744_v10 }
0x10bb   :  { %v4296_v37 = vpop.eup %4295 }
0x10bc   :  { %v2920_v8 = vadd.f32 %v2919_v23, %v2918_v16 }
0x10be   :  { %4297 = vtanh.f32 %v2920_v8 }
0x10c8   :  { %v4298_v12 = vpop.eup %4297 }
0x10c9   :  { %v2922_v30 = vmul.f32 %v4298_v12, %v4296_v37 }
0x10cb   :  { %v2929_v5 = vmul.f32 %v3013_v2, %v2922_v30 }
0x10cd   :  { %2930 = vadd.xlane.f32.xlu0 %v2929_v5 }
0x115a   :  { %v2931_v39 = vpop.xlane.xlu0 %2930 }
0x115b   :  { %v2934_v3 = vadd.f32 %v2933_v54, %v2931_v39 }
0x115d   :  { %v3014_v41 = vmul.f32 -1.442695, %v2934_v3 }
0x115f   :  { %4299 = vpow2.f32 %v3014_v41 }
0x1169   :  { %v4300_v7 = vpop.eup %4299 }
0x116a   :  { %v2938_v45 = vadd.f32 1.0, %v4300_v7 }
0x116c   :  { %4301 = vrcp.f32 %v2938_v45 }
0x1176   :  { %v4302_v50 = vpop.eup %4301 }
0x1177   :  { %2941 = vst [vmem:[%s5168_s4] sm:$0xff] %v4302_v50 }
0x1178   :  { %2946 = vsyncpa [#allocation4], 1 }

</bundles_post_ra>
